<compile_context>
chip_gen: v6e
topology: v6e:2x2x1
jax: 0.10.0
libtpu: 0.0.40
codegen_flags: <defaults>
</compile_context>

<pallas_src>
import math
import jax
import jax.numpy as jnp
from jax.experimental import pallas as pl
from jax.experimental.pallas import tpu as pltpu

OUT_FEATURES = 784          # 28 * 28
OUT_PADDED = 896            # 7 * 128 -> lane-aligned output width


def generator_kernel(x_ref,
                     w1_ref, b1_ref,
                     w2_ref, b2_ref,
                     w3_ref, b3_ref,
                     w4_ref, b4_ref,
                     o_ref):
    # Layer 1 has K=1: an MXU matmul would light up a single systolic row, so do
    # the outer product as a VPU broadcast multiply (keeps the MXU free).
    h = jnp.maximum(x_ref[...] * w1_ref[...] + b1_ref[...], 0.0)            # (bm, 64)  f32

    # Layers 2-4: bf16 operands on the MXU, f32 accumulation, bias + ReLU on VPU.
    h = jnp.dot(h.astype(jnp.bfloat16), w2_ref[...],
                preferred_element_type=jnp.float32) + b2_ref[...]
    h = jnp.maximum(h, 0.0)                                                  # (bm, 256)
    h = jnp.dot(h.astype(jnp.bfloat16), w3_ref[...],
                preferred_element_type=jnp.float32) + b3_ref[...]
    h = jnp.maximum(h, 0.0)                                                  # (bm, 512)
    z = jnp.dot(h.astype(jnp.bfloat16), w4_ref[...],
                preferred_element_type=jnp.float32) + b4_ref[...]            # (bm, 896)

    o_ref[...] = jax.nn.sigmoid(z).astype(o_ref.dtype)                       # EUP exp


def generator_forward(x, kernel_params, *, bm=None):
    """x: (B, 1) float32 -> (B, 28, 28) float32."""
    (w1, b1), (w2, b2), (w3, b3), (w4, b4) = kernel_params
    B = x.shape[0]

    if bm is None:
        # One grid step for small/medium batches (best on v5e/v6e single-TC).
        # On v7x, pass bm = ceil(B/2) (multiple of 8) so the "parallel" batch
        # axis shards across its 2 TensorCores.
        bm = B if B <= 512 else 512
    if B > bm:
        bm = max(8, (bm // 8) * 8)          # sublane-friendly tile when tiling
    n_steps = -(-B // bm)
    Bp = n_steps * bm
    if Bp != B:
        x = jnp.pad(x, ((0, Bp - B), (0, 0)))

    def full_block(arr):
        nd = arr.ndim
        # Whole (small) weight/bias resident in VMEM, block index constant.
        return pl.BlockSpec(arr.shape, lambda i, _nd=nd: (0,) * _nd)

    # Advisory cost so XLA can schedule/overlap this call inside a larger graph.
    flops = 2 * Bp * (64 * 256 + 256 * 512 + 512 * OUT_PADDED) + 2 * Bp * 64
    bytes_accessed = (x.size * 4
                      + w1.size * 4 + b1.size * 4
                      + w2.size * 2 + b2.size * 4
                      + w3.size * 2 + b3.size * 4
                      + w4.size * 2 + b4.size * 4
                      + Bp * OUT_PADDED * 4)
    cost = pl.CostEstimate(flops=int(flops),
                           transcendentals=int(Bp * OUT_PADDED),
                           bytes_accessed=int(bytes_accessed))

    out = pl.pallas_call(
        generator_kernel,
        out_shape=jax.ShapeDtypeStruct((Bp, OUT_PADDED), jnp.float32),
        grid=(n_steps,),
        in_specs=[
            pl.BlockSpec((bm, 1), lambda i: (i, 0)),     # x batch tile
            full_block(w1), full_block(b1),
            full_block(w2), full_block(b2),
            full_block(w3), full_block(b3),
            full_block(w4), full_block(b4),
        ],
        out_specs=pl.BlockSpec((bm, OUT_PADDED), lambda i: (i, 0)),
        compiler_params=pltpu.CompilerParams(
            dimension_semantics=("parallel",)),
        cost_estimate=cost,
    )(x, w1, b1, w2, b2, w3, b3, w4, b4)

    # Drop batch padding and the 784->896 lane padding; reshape is free glue.
    return out[:B, :OUT_FEATURES].reshape(B, 28, 28)


def init_params(key):
    """f32 reference params, matching the module's init scheme:
       weight ~ Normal(0, sqrt(1/in_features)); bias ~ U(-1/sqrt(in), 1/sqrt(in))."""
    dims = [1, 64, 256, 512, 784]
    params = []
    for i in range(4):
        fan_in, fan_out = dims[i], dims[i + 1]
        key, kw, kb = jax.random.split(key, 3)
        w = jax.random.normal(kw, (fan_in, fan_out), jnp.float32) * math.sqrt(1.0 / fan_in)
        bound = 1.0 / math.sqrt(fan_in)
        b = jax.random.uniform(kb, (1, fan_out), jnp.float32, minval=-bound, maxval=bound)
        params.append((w, b))
    return params


def pack_params(params):
    """Kernel-layout params: layer-1 stays f32 (runs on the VPU); layers 2-4
       weights in bf16 (f32 accumulation in the kernel); biases f32; last layer
       zero-padded from 784 to 896 output columns for lane-dense stores."""
    (w1, b1), (w2, b2), (w3, b3), (w4, b4) = params
    pad = OUT_PADDED - OUT_FEATURES
    w4p = jnp.pad(w4, ((0, 0), (0, pad))).astype(jnp.bfloat16)
    b4p = jnp.pad(b4, ((0, 0), (0, pad)))
    return ((w1, b1),
            (w2.astype(jnp.bfloat16), b2),
            (w3.astype(jnp.bfloat16), b3),
            (w4p, b4p))


def reference_forward(x, params):
    """Pure-f32 reference with the module's exact semantics."""
    h = x
    for i, (w, b) in enumerate(params):
        h = h @ w + b
        if i < 3:
            h = jnp.maximum(h, 0.0)
    return jax.nn.sigmoid(h).reshape(-1, 28, 28)


if __name__ == "__main__":
    key = jax.random.PRNGKey(0)
    kp, kx = jax.random.split(key)
    params = init_params(kp)
    kparams = pack_params(params)

    B = 16
    x = jax.random.normal(kx, (B, 1), jnp.float32)

    y = generator_forward(x, kparams)
    y = jax.block_until_ready(y)

    y_ref = reference_forward(x, params)
    assert y.shape == (B, 28, 28), y.shape
    # bf16 weights/activations in layers 2-4 -> loosened tolerance vs. f32 reference.
    err = float(jnp.max(jnp.abs(y - y_ref)))
    assert err < 2.5e-2, err

    print("KERNEL_OK")
</pallas_src>

<mosaic_0001>
module attributes {stable_mosaic.version = 11 : i64} {
  func.func @generator_kernel(%arg0: i32, %arg1: memref<16x1xf32, #tpu.memory_space<vmem>>, %arg2: memref<1x64xf32, #tpu.memory_space<vmem>>, %arg3: memref<1x64xf32, #tpu.memory_space<vmem>>, %arg4: memref<64x256xbf16, #tpu.memory_space<vmem>>, %arg5: memref<1x256xf32, #tpu.memory_space<vmem>>, %arg6: memref<256x512xbf16, #tpu.memory_space<vmem>>, %arg7: memref<1x512xf32, #tpu.memory_space<vmem>>, %arg8: memref<512x896xbf16, #tpu.memory_space<vmem>>, %arg9: memref<1x896xf32, #tpu.memory_space<vmem>>, %arg10: memref<16x896xf32, #tpu.memory_space<vmem>>) attributes {dimension_semantics = [#tpu.dimension_semantics<parallel>], iteration_bounds = array<i64: 1>, scalar_prefetch = 0 : i64, scratch_operands = 0 : i64, tpu.core_type = #tpu.core_type<tc>, window_params = [{transform_indices = @transform_0, window_bounds = array<i64: 16, 1>}, {pipeline_mode = #tpu.pipeline_mode<synchronous>, transform_indices = @transform_1, window_bounds = array<i64: 1, 64>}, {pipeline_mode = #tpu.pipeline_mode<synchronous>, transform_indices = @transform_2, window_bounds = array<i64: 1, 64>}, {pipeline_mode = #tpu.pipeline_mode<synchronous>, transform_indices = @transform_3, window_bounds = array<i64: 64, 256>}, {pipeline_mode = #tpu.pipeline_mode<synchronous>, transform_indices = @transform_4, window_bounds = array<i64: 1, 256>}, {pipeline_mode = #tpu.pipeline_mode<synchronous>, transform_indices = @transform_5, window_bounds = array<i64: 256, 512>}, {pipeline_mode = #tpu.pipeline_mode<synchronous>, transform_indices = @transform_6, window_bounds = array<i64: 1, 512>}, {pipeline_mode = #tpu.pipeline_mode<synchronous>, transform_indices = @transform_7, window_bounds = array<i64: 512, 896>}, {pipeline_mode = #tpu.pipeline_mode<synchronous>, transform_indices = @transform_8, window_bounds = array<i64: 1, 896>}, {transform_indices = @transform_9, window_bounds = array<i64: 16, 896>}]} {
    %c0 = arith.constant 0 : index
    %c0_0 = arith.constant 0 : index
    %0 = vector.load %arg1[%c0, %c0_0] : memref<16x1xf32, #tpu.memory_space<vmem>>, vector<16x1xf32>
    %c0_1 = arith.constant 0 : index
    %c0_2 = arith.constant 0 : index
    %1 = vector.load %arg2[%c0_1, %c0_2] : memref<1x64xf32, #tpu.memory_space<vmem>>, vector<1x64xf32>
    %2 = vector.broadcast %0 : vector<16x1xf32> to vector<16x64xf32>
    %3 = vector.broadcast %1 : vector<1x64xf32> to vector<16x64xf32>
    %4 = arith.mulf %2, %3 : vector<16x64xf32>
    %c0_3 = arith.constant 0 : index
    %c0_4 = arith.constant 0 : index
    %5 = vector.load %arg3[%c0_3, %c0_4] : memref<1x64xf32, #tpu.memory_space<vmem>>, vector<1x64xf32>
    %6 = vector.broadcast %5 : vector<1x64xf32> to vector<16x64xf32>
    %7 = arith.addf %4, %6 : vector<16x64xf32>
    %cst = arith.constant 0.000000e+00 : f32
    %8 = vector.broadcast %cst : f32 to vector<16x64xf32>
    %9 = arith.maximumf %7, %8 : vector<16x64xf32>
    %10 = arith.truncf %9 : vector<16x64xf32> to vector<16x64xbf16>
    %c0_5 = arith.constant 0 : index
    %c0_6 = arith.constant 0 : index
    %11 = vector.load %arg4[%c0_5, %c0_6] : memref<64x256xbf16, #tpu.memory_space<vmem>>, vector<64x256xbf16>
    %cst_7 = arith.constant dense<0.000000e+00> : vector<16x256xf32>
    %12 = tpu.matmul %10, %11, %cst_7 {dimension_numbers = #tpu.dot_dimension_numbers<[1], [0], [0], [1], [0, 0, 1, 1], [], []>} : vector<16x64xbf16>, vector<64x256xbf16>, vector<16x256xf32> -> vector<16x256xf32>
    %c0_8 = arith.constant 0 : index
    %c0_9 = arith.constant 0 : index
    %13 = vector.load %arg5[%c0_8, %c0_9] : memref<1x256xf32, #tpu.memory_space<vmem>>, vector<1x256xf32>
    %14 = vector.broadcast %13 : vector<1x256xf32> to vector<16x256xf32>
    %15 = arith.addf %12, %14 : vector<16x256xf32>
    %cst_10 = arith.constant 0.000000e+00 : f32
    %16 = vector.broadcast %cst_10 : f32 to vector<16x256xf32>
    %17 = arith.maximumf %15, %16 : vector<16x256xf32>
    %18 = arith.truncf %17 : vector<16x256xf32> to vector<16x256xbf16>
    %c0_11 = arith.constant 0 : index
    %c0_12 = arith.constant 0 : index
    %19 = vector.load %arg6[%c0_11, %c0_12] : memref<256x512xbf16, #tpu.memory_space<vmem>>, vector<256x512xbf16>
    %cst_13 = arith.constant dense<0.000000e+00> : vector<16x512xf32>
    %20 = tpu.matmul %18, %19, %cst_13 {dimension_numbers = #tpu.dot_dimension_numbers<[1], [0], [0], [1], [0, 0, 1, 1], [], []>} : vector<16x256xbf16>, vector<256x512xbf16>, vector<16x512xf32> -> vector<16x512xf32>
    %c0_14 = arith.constant 0 : index
    %c0_15 = arith.constant 0 : index
    %21 = vector.load %arg7[%c0_14, %c0_15] : memref<1x512xf32, #tpu.memory_space<vmem>>, vector<1x512xf32>
    %22 = vector.broadcast %21 : vector<1x512xf32> to vector<16x512xf32>
    %23 = arith.addf %20, %22 : vector<16x512xf32>
    %cst_16 = arith.constant 0.000000e+00 : f32
    %24 = vector.broadcast %cst_16 : f32 to vector<16x512xf32>
    %25 = arith.maximumf %23, %24 : vector<16x512xf32>
    %26 = arith.truncf %25 : vector<16x512xf32> to vector<16x512xbf16>
    %c0_17 = arith.constant 0 : index
    %c0_18 = arith.constant 0 : index
    %27 = vector.load %arg8[%c0_17, %c0_18] : memref<512x896xbf16, #tpu.memory_space<vmem>>, vector<512x896xbf16>
    %cst_19 = arith.constant dense<0.000000e+00> : vector<16x896xf32>
    %28 = tpu.matmul %26, %27, %cst_19 {dimension_numbers = #tpu.dot_dimension_numbers<[1], [0], [0], [1], [0, 0, 1, 1], [], []>} : vector<16x512xbf16>, vector<512x896xbf16>, vector<16x896xf32> -> vector<16x896xf32>
    %c0_20 = arith.constant 0 : index
    %c0_21 = arith.constant 0 : index
    %29 = vector.load %arg9[%c0_20, %c0_21] : memref<1x896xf32, #tpu.memory_space<vmem>>, vector<1x896xf32>
    %30 = vector.broadcast %29 : vector<1x896xf32> to vector<16x896xf32>
    %31 = arith.addf %28, %30 : vector<16x896xf32>
    %32 = arith.negf %31 : vector<16x896xf32>
    %33 = math.exp %32 : vector<16x896xf32>
    %cst_22 = arith.constant 1.000000e+00 : f32
    %34 = vector.broadcast %cst_22 : f32 to vector<16x896xf32>
    %35 = arith.addf %34, %33 : vector<16x896xf32>
    %36 = arith.divf %34, %35 : vector<16x896xf32>
    %c0_23 = arith.constant 0 : index
    %c0_24 = arith.constant 0 : index
    %37 = vector.load %arg10[%c0_23, %c0_24] : memref<16x896xf32, #tpu.memory_space<vmem>>, vector<16x896xf32>
    tpu.vector_store %arg10[%c0_23, %c0_24], %36 {strides = array<i32>} : memref<16x896xf32, #tpu.memory_space<vmem>>, vector<16x896xf32>,
    return
  }
  func.func @transform_0(%arg0: i32) -> (i32, i32) {
    %c0_i32 = arith.constant 0 : i32
    %c0_i32_0 = arith.constant 0 : i32
    return %arg0, %c0_i32 : i32, i32
  }
  func.func @transform_1(%arg0: i32) -> (i32, i32) {
    %c0_i32 = arith.constant 0 : i32
    %c0_i32_0 = arith.constant 0 : i32
    %c0_i32_1 = arith.constant 0 : i32
    return %c0_i32, %c0_i32_0 : i32, i32
  }
  func.func @transform_2(%arg0: i32) -> (i32, i32) {
    %c0_i32 = arith.constant 0 : i32
    %c0_i32_0 = arith.constant 0 : i32
    %c0_i32_1 = arith.constant 0 : i32
    return %c0_i32, %c0_i32_0 : i32, i32
  }
  func.func @transform_3(%arg0: i32) -> (i32, i32) {
    %c0_i32 = arith.constant 0 : i32
    %c0_i32_0 = arith.constant 0 : i32
    %c0_i32_1 = arith.constant 0 : i32
    return %c0_i32, %c0_i32_0 : i32, i32
  }
  func.func @transform_4(%arg0: i32) -> (i32, i32) {
    %c0_i32 = arith.constant 0 : i32
    %c0_i32_0 = arith.constant 0 : i32
    %c0_i32_1 = arith.constant 0 : i32
    return %c0_i32, %c0_i32_0 : i32, i32
  }
  func.func @transform_5(%arg0: i32) -> (i32, i32) {
    %c0_i32 = arith.constant 0 : i32
    %c0_i32_0 = arith.constant 0 : i32
    %c0_i32_1 = arith.constant 0 : i32
    return %c0_i32, %c0_i32_0 : i32, i32
  }
  func.func @transform_6(%arg0: i32) -> (i32, i32) {
    %c0_i32 = arith.constant 0 : i32
    %c0_i32_0 = arith.constant 0 : i32
    %c0_i32_1 = arith.constant 0 : i32
    return %c0_i32, %c0_i32_0 : i32, i32
  }
  func.func @transform_7(%arg0: i32) -> (i32, i32) {
    %c0_i32 = arith.constant 0 : i32
    %c0_i32_0 = arith.constant 0 : i32
    %c0_i32_1 = arith.constant 0 : i32
    return %c0_i32, %c0_i32_0 : i32, i32
  }
  func.func @transform_8(%arg0: i32) -> (i32, i32) {
    %c0_i32 = arith.constant 0 : i32
    %c0_i32_0 = arith.constant 0 : i32
    %c0_i32_1 = arith.constant 0 : i32
    return %c0_i32, %c0_i32_0 : i32, i32
  }
  func.func @transform_9(%arg0: i32) -> (i32, i32) {
    %c0_i32 = arith.constant 0 : i32
    %c0_i32_0 = arith.constant 0 : i32
    return %arg0, %c0_i32 : i32, i32
  }
}

</mosaic_0001>

<bundles_post_ra>
// kernel: tpu_custom_call.1
= control target key start
LH: loop header
LB: loop body
LE: loop exit
PB: predicated region body
PF: predicated region fallthrough
CT: control target
= control target key end

     0   :  { %14 = vsyncpa [#allocation3], 0  ;;  %s3723_s0 = inlined_call_operand.vmem [shape: f32[16,1], index: 0, kind: input, shape index: {}]   ;;  %s3724_s1 = inlined_call_operand.vmem [shape: f32[1,64], index: 1, kind: input, shape index: {}]   ;;  %s3725_s2 = inlined_call_operand.vmem [shape: f32[1,64], index: 2, kind: input, shape index: {}]   ;;  %s3726_s3 = inlined_call_operand.hbm [shape: bf16[64,256], index: 3, kind: input, shape index: {}]   ;;  %s3727_s4 = inlined_call_operand.vmem [shape: f32[1,256], index: 4, kind: input, shape index: {}]   ;;  %s3728_s5 = inlined_call_operand.hbm [shape: bf16[256,512], index: 5, kind: input, shape index: {}]   ;;  %s3729_s6 = inlined_call_operand.vmem [shape: f32[1,512], index: 6, kind: input, shape index: {}]   ;;  %s3730_s7 = inlined_call_operand.hbm [shape: bf16[512,896], index: 7, kind: input, shape index: {}]   ;;  %s3731_s8 = inlined_call_operand.vmem [shape: f32[1,896], index: 8, kind: input, shape index: {}]   ;;  %s3732_s9 = inlined_call_operand.hbm [shape: f32[16,896], index: 9, kind: output, shape index: {}]  }
   0x1   :  { %15 = vsyncpa [#allocation6], 0 }
   0x2   :  { %16 = vsyncpa [#allocation4], 0  ;;  %s3567_s30 = smov [#allocation5]  }
   0x3   :  { %s42_s10 = sshll.u32 %s3567_s30, 4  ;;  %s43_s10 = int_to_ptr.vmem [resolvable:$true] %s42_s10 }
   0x4   :  { %s3489_s11 = scalar_lea.vmem %s43_s10, 8192  ;;  %p3494_p1 = scmp.lt.s32.totalorder %s43_s10, %s43_s10 }
   0x5   :  { %p3490_p0 = scmp.ne.s32.totalorder %s43_s10, %s3489_s11  ;;  %p3495_p2 = scmp.lt.s32.totalorder %s3489_s11, %s3489_s11 }
   0x7   :  { %p3496_p3 = por %p3495_p2, %p3494_p1 }
   0x9   :  { %p3497_p4 = pnand %p3496_p3, %p3490_p0 }
   0xb   :  { %3500 = shalt.err (!%p3497_p4)
}
   0xc   :  { %s3568_s12 = smov 256   ;;  %s3569_s13 = smov 16  }
   0xd   :  { %48 = dma.hbm_to_vmem [thread:$0]  %s3728_s5, 8192, %s43_s10, [#allocation6], %s3568_s12, %s3568_s12, %s3569_s13  }
   0xe   :  { %s3570_s16 = smov [#allocation2]  }
   0xf   :  { %s28_s17 = sshll.u32 %s3570_s16, 4  ;;  %s29_s17 = int_to_ptr.vmem [resolvable:$true] %s28_s17 }
  0x10   :  { %s3509_s18 = scalar_lea.vmem %s29_s17, 1024  ;;  %p3514_p6 = scmp.lt.s32.totalorder %s29_s17, %s29_s17 }
  0x11   :  { %p3510_p5 = scmp.ne.s32.totalorder %s29_s17, %s3509_s18  ;;  %p3515_p7 = scmp.lt.s32.totalorder %s3509_s18, %s3509_s18 }
  0x13   :  { %p3516_p8 = por %p3515_p7, %p3514_p6 }
  0x15   :  { %p3517_p9 = pnand %p3516_p8, %p3510_p5 }
  0x17   :  { %3520 = shalt.err (!%p3517_p9)
}
  0x18   :  { %s3571_s19 = smov 128   ;;  %s3572_s20 = smov 8  }
  0x19   :  { %34 = dma.hbm_to_vmem [thread:$0]  %s3726_s3, 1024, %s29_s17, [#allocation3], %s3571_s19, %s3571_s19, %s3572_s20  }
  0x1a   :  { %s3573_s23 = smov [#allocation7]  }
  0x1b   :  { %s56_s24 = sshll.u32 %s3573_s23, 4  ;;  %s57_s24 = int_to_ptr.vmem [resolvable:$true] %s56_s24 }
  0x1c   :  { %s3529_s5 = scalar_lea.vmem %s57_s24, 28672  ;;  %p3534_p11 = scmp.lt.s32.totalorder %s57_s24, %s57_s24 }
  0x1d   :  { %p3530_p10 = scmp.ne.s32.totalorder %s57_s24, %s3529_s5  ;;  %p3535_p12 = scmp.lt.s32.totalorder %s3529_s5, %s3529_s5 }
  0x1f   :  { %p3536_p13 = por %p3535_p12, %p3534_p11 }
  0x21   :  { %p3537_p0 = pnand %p3536_p13, %p3530_p10 }
  0x23   :  { %3540 = shalt.err (!%p3537_p0)
}
  0x24   :  { %s3574_s25 = smov 448   ;;  %s3575_s26 = smov 28  }
  0x25   :  { %62 = dma.hbm_to_vmem [thread:$0]  %s3730_s7, 28672, %s57_s24, [#allocation6], %s3574_s25, %s3574_s25, %s3575_s26  }
  0x26   :  { %3561 = dma.done.wait [#allocation3], 1024  }
  0x27   :  { %3562 = vsyncadd [#allocation3], 4294966272 }
  0x28   :  { %3563 = dma.done.wait [#allocation6], 36864  }
  0x29   :  { %3564 = vsyncadd [#allocation6], 4294930432  ;;  %v3576_v0 = vmov 0   ;;  %v75_v1 = vld [vmem:[%s3723_s0] sm:$0xff]  ;;  %v2997_v2 = vld [vmem:[#allocation2 + $0x34] ss:$8 sps:$4 sm:$0xff]  }
  0x2a   :  { %2996 = vset.pattern.permute.xlu0 %v3576_v0  ;;  %204 = vmatprep.mubr.bf16.mxu0 %v3576_v0  ;;  %v2999_v3 = vld [vmem:[#allocation2 + $0x30] ss:$8 sps:$4 sm:$0xff]   ;;  %v76_v4 = vld [vmem:[%s3723_s0 + $0x8] sm:$0xff]  ;;  %v3003_v7 = vld [vmem:[#allocation2 + $0x14] ss:$8 sps:$4 sm:$0xff]   ;;  %vm168_vm0 = vcmask 523264  }
  0x2b   :  { %80 = vperm.xlu0 %2996, %v75_v1   ;;  %180 = vmatprep.subr.bf16.mxu0 %v2997_v2  ;;  %v3000_v5 = vld [vmem:[#allocation2 + $0x24] ss:$8 sps:$4 sm:$0xff]   ;;  %v3002_v6 = vld [vmem:[#allocation2 + $0x20] ss:$8 sps:$4 sm:$0xff]   ;;  %v3005_v8 = vld [vmem:[#allocation2 + $0x10] ss:$8 sps:$4 sm:$0xff]  }
  0x2c   :  { %181 = vmatpush1.bf16.msra.mxu0 %v2999_v3  ;;  %v3006_v9 = vld [vmem:[#allocation2 + $0x4] ss:$8 sps:$4 sm:$0xff]   ;;  %v3014_v11 = vld [vmem:[#allocation5 + $0xe0] ss:$16 sps:$4 sm:$0xff]   ;;  %v3011_v48 = vld [vmem:[#allocation5 + $0xe8] ss:$16 sps:$4 sm:$0xff]  }
  0x2d   :  { %182 = vmatprep.subr.bf16.mxu0 %v3000_v5  ;;  %v3009_v10 = vld [vmem:[#allocation5 + $0xe4] ss:$16 sps:$4 sm:$0xff]   ;;  %v3008_v13 = vld [vmem:[#allocation2] ss:$8 sps:$4 sm:$0xff]   ;;  %v3013_v14 = vld [vmem:[#allocation5 + $0xec] ss:$16 sps:$4 sm:$0xff]  }
  0x2e   :  { %v3015_v12 = vld [vmem:[#allocation5 + $0xc4] ss:$16 sps:$4 sm:$0xff]   ;;  %627 = vmatprep.subr.bf16.mxu1 %v3009_v10  ;;  %v3020_v15 = vld [vmem:[#allocation5 + $0xc0] ss:$16 sps:$4 sm:$0xff]   ;;  %v3019_v50 = vld [vmem:[#allocation5 + $0xcc] ss:$16 sps:$4 sm:$0xff]  }
  0x2f   :  { %85 = vperm.xlu0 %2996, %v76_v4   ;;  %628 = vmatpush1.bf16.msra.mxu1 %v3014_v11  ;;  %v3021_v16 = vld [vmem:[#allocation5 + $0xa4] ss:$16 sps:$4 sm:$0xff]   ;;  %v3026_v17 = vld [vmem:[#allocation5 + $0xa0] ss:$16 sps:$4 sm:$0xff]   ;;  %v3017_v51 = vld [vmem:[#allocation5 + $0xc8] ss:$16 sps:$4 sm:$0xff]  }
  0x30   :  { %183 = vmatpush1.bf16.msra.mxu0 %v3002_v6  ;;  %629 = vmatprep.subr.bf16.mxu1 %v3015_v12  ;;  %v3027_v18 = vld [vmem:[#allocation5 + $0x84] ss:$16 sps:$4 sm:$0xff]   ;;  %v3032_v19 = vld [vmem:[#allocation5 + $0x80] ss:$16 sps:$4 sm:$0xff]   ;;  %v3025_v52 = vld [vmem:[#allocation5 + $0xac] ss:$16 sps:$4 sm:$0xff]  }
  0x31   :  { %184 = vmatprep.subr.bf16.mxu0 %v3003_v7  ;;  %v3033_v20 = vld [vmem:[#allocation5 + $0x64] ss:$16 sps:$4 sm:$0xff]   ;;  %v3038_v21 = vld [vmem:[#allocation5 + $0x60] ss:$16 sps:$4 sm:$0xff]   ;;  %v3023_v53 = vld [vmem:[#allocation5 + $0xa8] ss:$16 sps:$4 sm:$0xff]  }
  0x32   :  { %v3039_v22 = vld [vmem:[#allocation5 + $0x44] ss:$16 sps:$4 sm:$0xff]   ;;  %v3044_v23 = vld [vmem:[#allocation5 + $0x40] ss:$16 sps:$4 sm:$0xff]   ;;  %v3031_v54 = vld [vmem:[#allocation5 + $0x8c] ss:$16 sps:$4 sm:$0xff]  }
  0x33   :  { %630 = vmatpush1.bf16.msra.mxu1 %v3020_v15  ;;  %v3045_v24 = vld [vmem:[#allocation5 + $0x24] ss:$16 sps:$4 sm:$0xff]   ;;  %v3050_v25 = vld [vmem:[#allocation5 + $0x20] ss:$16 sps:$4 sm:$0xff]   ;;  %v3029_v55 = vld [vmem:[#allocation5 + $0x88] ss:$16 sps:$4 sm:$0xff]  }
  0x34   :  { %185 = vmatpush1.bf16.msra.mxu0 %v3005_v8  ;;  %631 = vmatprep.subr.bf16.mxu1 %v3021_v16  ;;  %v3051_v26 = vld [vmem:[#allocation5 + $0x4] ss:$16 sps:$4 sm:$0xff]   ;;  %v3056_v27 = vld [vmem:[#allocation5] ss:$16 sps:$4 sm:$0xff]   ;;  %v3037_v56 = vld [vmem:[#allocation5 + $0x6c] ss:$16 sps:$4 sm:$0xff]  }
  0x35   :  { %186 = vmatprep.subr.bf16.mxu0 %v3006_v9  ;;  %v3057_v28 = vld [vmem:[#allocation5 + $0x1e4] ss:$16 sps:$4 sm:$0xff]   ;;  %v3062_v29 = vld [vmem:[#allocation5 + $0x1e0] ss:$16 sps:$4 sm:$0xff]   ;;  %v3035_v57 = vld [vmem:[#allocation5 + $0x68] ss:$16 sps:$4 sm:$0xff]  }
  0x36   :  { %v3063_v30 = vld [vmem:[#allocation5 + $0x1c4] ss:$16 sps:$4 sm:$0xff]   ;;  %v3068_v31 = vld [vmem:[#allocation5 + $0x1c0] ss:$16 sps:$4 sm:$0xff]   ;;  %v3043_v58 = vld [vmem:[#allocation5 + $0x4c] ss:$16 sps:$4 sm:$0xff]  }
  0x37   :  { %632 = vmatpush1.bf16.msra.mxu1 %v3026_v17  ;;  %v3069_v32 = vld [vmem:[#allocation5 + $0x1a4] ss:$16 sps:$4 sm:$0xff]   ;;  %v3074_v33 = vld [vmem:[#allocation5 + $0x1a0] ss:$16 sps:$4 sm:$0xff]   ;;  %v3041_v59 = vld [vmem:[#allocation5 + $0x48] ss:$16 sps:$4 sm:$0xff]  }
  0x38   :  { %187 = vmatpush1.bf16.msra.mxu0 %v3008_v13  ;;  %633 = vmatprep.subr.bf16.mxu1 %v3027_v18  ;;  %v3075_v34 = vld [vmem:[#allocation5 + $0x184] ss:$16 sps:$4 sm:$0xff]   ;;  %v3080_v35 = vld [vmem:[#allocation5 + $0x180] ss:$16 sps:$4 sm:$0xff]   ;;  %v3049_v60 = vld [vmem:[#allocation5 + $0x2c] ss:$16 sps:$4 sm:$0xff]  }
  0x39   :  { %670 = vmatprep.subr.bf16.mxu0 %v3013_v14  ;;  %v3081_v36 = vld [vmem:[#allocation5 + $0x164] ss:$16 sps:$4 sm:$0xff]   ;;  %v3086_v37 = vld [vmem:[#allocation5 + $0x160] ss:$16 sps:$4 sm:$0xff]   ;;  %v3047_v61 = vld [vmem:[#allocation5 + $0x28] ss:$16 sps:$4 sm:$0xff]  }
  0x3a   :  { %v2626_v38 = vld [vmem:[%s3724_s1] ss:$0 sm:$0xff]  ;;  %v3055_v62 = vld [vmem:[#allocation5 + $0xc] ss:$16 sps:$4 sm:$0xff]   ;;  %v3053_v63 = vld [vmem:[#allocation5 + $0x8] ss:$16 sps:$4 sm:$0xff]  }
  0x3b   :  { %634 = vmatpush1.bf16.msra.mxu1 %v3032_v19  ;;  %v2627_v39 = vld [vmem:[%s3725_s2] ss:$0 sm:$0xff]  ;;  %v3061_v0 = vld [vmem:[#allocation5 + $0x1ec] ss:$16 sps:$4 sm:$0xff]   ;;  %v3059_v1 = vld [vmem:[#allocation5 + $0x1e8] ss:$16 sps:$4 sm:$0xff]  }
  0x3c   :  { %635 = vmatprep.subr.bf16.mxu1 %v3033_v20  ;;  %v3067_v2 = vld [vmem:[#allocation5 + $0x1cc] ss:$16 sps:$4 sm:$0xff]   ;;  %v3065_v3 = vld [vmem:[#allocation5 + $0x1c8] ss:$16 sps:$4 sm:$0xff]   ;;  %v3087_v10 = vld [vmem:[#allocation5 + $0x144] ss:$16 sps:$4 sm:$0xff]  }
  0x3d   :  { %v3073_v4 = vld [vmem:[#allocation5 + $0x1ac] ss:$16 sps:$4 sm:$0xff]   ;;  %v3071_v5 = vld [vmem:[#allocation5 + $0x1a8] ss:$16 sps:$4 sm:$0xff]   ;;  %v3092_v13 = vld [vmem:[#allocation5 + $0x140] ss:$16 sps:$4 sm:$0xff]  }
  0x3e   :  { %v3079_v6 = vld [vmem:[#allocation5 + $0x18c] ss:$16 sps:$4 sm:$0xff]   ;;  %v3077_v7 = vld [vmem:[#allocation5 + $0x188] ss:$16 sps:$4 sm:$0xff]   ;;  %v3093_v14 = vld [vmem:[#allocation5 + $0x124] ss:$16 sps:$4 sm:$0xff]  }
  0x3f   :  { %636 = vmatpush1.bf16.msra.mxu1 %v3038_v21  ;;  %v3085_v8 = vld [vmem:[#allocation5 + $0x16c] ss:$16 sps:$4 sm:$0xff]   ;;  %v3083_v9 = vld [vmem:[#allocation5 + $0x168] ss:$16 sps:$4 sm:$0xff]   ;;  %v3098_v17 = vld [vmem:[#allocation5 + $0x120] ss:$16 sps:$4 sm:$0xff]  }
  0x40   :  { %637 = vmatprep.subr.bf16.mxu1 %v3039_v22  ;;  %v3091_v11 = vld [vmem:[#allocation5 + $0x14c] ss:$16 sps:$4 sm:$0xff]   ;;  %v3089_v12 = vld [vmem:[#allocation5 + $0x148] ss:$16 sps:$4 sm:$0xff]   ;;  %v3099_v18 = vld [vmem:[#allocation5 + $0x104] ss:$16 sps:$4 sm:$0xff]  }
  0x41   :  { %v3097_v15 = vld [vmem:[#allocation5 + $0x12c] ss:$16 sps:$4 sm:$0xff]   ;;  %v3095_v16 = vld [vmem:[#allocation5 + $0x128] ss:$16 sps:$4 sm:$0xff]   ;;  %v3104_v21 = vld [vmem:[#allocation5 + $0x100] ss:$16 sps:$4 sm:$0xff]  }
  0x42   :  { %v3103_v19 = vld [vmem:[#allocation5 + $0x10c] ss:$16 sps:$4 sm:$0xff]   ;;  %v3101_v20 = vld [vmem:[#allocation5 + $0x108] ss:$16 sps:$4 sm:$0xff]  }
  0x43   :  { %638 = vmatpush1.bf16.msra.mxu1 %v3044_v23  ;;  %v3107_v22 = vld [vmem:[#allocation7 + $0x18c] ss:$28 sps:$4 sm:$0xff]  }
  0x44   :  { %639 = vmatprep.subr.bf16.mxu1 %v3045_v24  ;;  %v3110_v23 = vld [vmem:[#allocation7 + $0x50c] ss:$28 sps:$4 sm:$0xff]   ;;  %v118_v24 = vlaneseq }
  0x47   :  { %640 = vmatpush1.bf16.msra.mxu1 %v3050_v25  ;;  %v3651_v25 = vshrl.u32 %v118_v24, 7  ;;  %v3176_v24 = vld [vmem:[#allocation7 + $0x624] ss:$28 sps:$4 sm:$0xff]  }
  0x48   :  { %641 = vmatprep.subr.bf16.mxu1 %v3051_v26 }
  0x49   :  { %v3654_v26 = vsub.s32 1, %v3651_v25 }
  0x4b   :  { %642 = vmatpush1.bf16.msra.mxu1 %v3056_v27  ;;  %v3657_v27 = vsub.s32 0, %v3651_v25 }
  0x4c   :  { %643 = vmatprep.subr.bf16.mxu1 %v3057_v28  ;;  %v116_v28 = vld [vmem:[%s3727_s4] sm:$0x3] }
  0x4f   :  { %644 = vmatpush2.bf16.msra.mxu1 %v3062_v29 }
  0x50   :  { %645 = vmatprep.subr.bf16.mxu1 %v3063_v30  ;;  %v125_v30 = vrot.slane %v116_v28, %v3654_v26 }
  0x53   :  { %646 = vmatpush2.bf16.msra.mxu1 %v3068_v31  ;;  %v121_v31 = vrot.slane %v116_v28, %v3657_v27  ;;  %v3171_v28 = vld [vmem:[#allocation7 + $0x2a0] ss:$28 sps:$4 sm:$0xff]  }
  0x54   :  { %647 = vmatprep.subr.bf16.mxu1 %v3069_v32 }
  0x57   :  { %648 = vmatpush2.bf16.msra.mxu1 %v3074_v33 }
  0x58   :  { %649 = vmatprep.subr.bf16.mxu1 %v3075_v34 }
  0x5b   :  { %650 = vmatpush2.bf16.msra.mxu1 %v3080_v35 }
  0x5c   :  { %651 = vmatprep.subr.bf16.mxu1 %v3081_v36 }
  0x5f   :  { %652 = vmatpush2.bf16.msra.mxu1 %v3086_v37 }
  0x60   :  { %653 = vmatprep.subr.bf16.mxu1 %v3087_v10  ;;  %v3150_v10 = vld [vmem:[#allocation7 + $0x380] ss:$28 sps:$4 sm:$0xff]  }
  0x63   :  { %654 = vmatpush2.bf16.msra.mxu1 %v3092_v13  ;;  %v3153_v13 = vld [vmem:[#allocation7 + $0x348] ss:$28 sps:$4 sm:$0xff]  }
  0x64   :  { %655 = vmatprep.subr.bf16.mxu1 %v3093_v14  ;;  %v3156_v14 = vld [vmem:[#allocation7 + $0x6c8] ss:$28 sps:$4 sm:$0xff]  }
  0x67   :  { %656 = vmatpush2.bf16.msra.mxu1 %v3098_v17  ;;  %v3159_v17 = vld [vmem:[#allocation7 + $0x310] ss:$28 sps:$4 sm:$0xff]  }
  0x68   :  { %657 = vmatprep.subr.bf16.mxu1 %v3099_v18  ;;  %v3162_v18 = vld [vmem:[#allocation7 + $0x690] ss:$28 sps:$4 sm:$0xff]  }
  0x6b   :  { %658 = vmatpush2.bf16.msra.mxu1 %v3104_v21  ;;  %v3165_v21 = vld [vmem:[#allocation7 + $0x2d8] ss:$28 sps:$4 sm:$0xff]  }
  0x6c   :  { %2170 = vmatprep.subr.bf16.mxu1 %v3107_v22  ;;  %v3168_v22 = vld [vmem:[#allocation7 + $0x658] ss:$28 sps:$4 sm:$0xff]  }
  0xa6   :  { %v81_v40 = vpop.permute.xlu0 %80 }
  0xa7   :  { %v94_v41 = vmul.f32 %v2626_v38, %v81_v40 }
  0xa9   :  { %v103_v43 = vadd.f32 %v2627_v39, %v94_v41 }
  0xaa   :  { %v86_v42 = vpop.permute.xlu0 %85 }
  0xab   :  { %v95_v44 = vmul.f32 %v2626_v38, %v86_v42  ;;  %v105_v46 = vmax.f32 %v103_v43, 0.0 }
  0xad   :  { %v104_v45 = vadd.f32 %v2627_v39, %v95_v44  ;;  %v3105_v44 = vld [vmem:[#allocation7 + $0x188] ss:$28 sps:$4 sm:$0xff]  }
  0xaf   :  { %v106_v47 = vmax.f32 %v104_v45, 0.0  ;;  %v3108_v45 = vld [vmem:[#allocation7 + $0x508] ss:$28 sps:$4 sm:$0xff]  }
  0xb1   :  { %v107_v49 = vpack.c.bf16 %v106_v47, %v105_v46  ;;  %v3113_v47 = vld [vmem:[#allocation7 + $0x154] ss:$28 sps:$4 sm:$0xff]  }
  0xb3   :  { %2636 = vmatmul.mubr.msk.bf16.vlgmr.msra.gmra.mxu0 %vm168_vm0, %v107_v49  ;;  %v3111_v49 = vld [vmem:[#allocation7 + $0x150] ss:$28 sps:$4 sm:$0xff]  }
  0xb4   :  { %671 = vmatpush1.bf16.msra.mxu0 %v3011_v48  ;;  %v3116_v48 = vld [vmem:[#allocation7 + $0x4d4] ss:$28 sps:$4 sm:$0xff]  }
  0xb5   :  { %672 = vmatprep.subr.bf16.mxu0 %v3019_v50  ;;  %v3114_v50 = vld [vmem:[#allocation7 + $0x4d0] ss:$28 sps:$4 sm:$0xff]  }
  0xb8   :  { %673 = vmatpush1.bf16.msra.mxu0 %v3017_v51  ;;  %v3119_v51 = vld [vmem:[#allocation7 + $0x11c] ss:$28 sps:$4 sm:$0xff]  }
  0xb9   :  { %674 = vmatprep.subr.bf16.mxu0 %v3025_v52  ;;  %v3122_v52 = vld [vmem:[#allocation7 + $0x49c] ss:$28 sps:$4 sm:$0xff]  }
  0xbc   :  { %675 = vmatpush1.bf16.msra.mxu0 %v3023_v53  ;;  %v3117_v53 = vld [vmem:[#allocation7 + $0x118] ss:$28 sps:$4 sm:$0xff]  }
  0xbd   :  { %676 = vmatprep.subr.bf16.mxu0 %v3031_v54  ;;  %v3120_v54 = vld [vmem:[#allocation7 + $0x498] ss:$28 sps:$4 sm:$0xff]  }
  0xc0   :  { %677 = vmatpush1.bf16.msra.mxu0 %v3029_v55  ;;  %v3125_v55 = vld [vmem:[#allocation7 + $0xe4] ss:$28 sps:$4 sm:$0xff]  }
  0xc1   :  { %678 = vmatprep.subr.bf16.mxu0 %v3037_v56  ;;  %v3128_v56 = vld [vmem:[#allocation7 + $0x464] ss:$28 sps:$4 sm:$0xff]  }
  0xc4   :  { %679 = vmatpush1.bf16.msra.mxu0 %v3035_v57  ;;  %v3123_v57 = vld [vmem:[#allocation7 + $0xe0] ss:$28 sps:$4 sm:$0xff]  }
  0xc5   :  { %680 = vmatprep.subr.bf16.mxu0 %v3043_v58  ;;  %v3126_v58 = vld [vmem:[#allocation7 + $0x460] ss:$28 sps:$4 sm:$0xff]  }
  0xc8   :  { %681 = vmatpush1.bf16.msra.mxu0 %v3041_v59  ;;  %v3131_v59 = vld [vmem:[#allocation7 + $0xac] ss:$28 sps:$4 sm:$0xff]  }
  0xc9   :  { %682 = vmatprep.subr.bf16.mxu0 %v3049_v60  ;;  %v3134_v60 = vld [vmem:[#allocation7 + $0x42c] ss:$28 sps:$4 sm:$0xff]  }
  0xcc   :  { %683 = vmatpush1.bf16.msra.mxu0 %v3047_v61  ;;  %v3129_v61 = vld [vmem:[#allocation7 + $0xa8] ss:$28 sps:$4 sm:$0xff]  }
  0xcd   :  { %684 = vmatprep.subr.bf16.mxu0 %v3055_v62  ;;  %v3132_v62 = vld [vmem:[#allocation7 + $0x428] ss:$28 sps:$4 sm:$0xff]  }
  0xd0   :  { %685 = vmatpush1.bf16.msra.mxu0 %v3053_v63  ;;  %v3137_v63 = vld [vmem:[#allocation7 + $0x74] ss:$28 sps:$4 sm:$0xff]  }
  0xd1   :  { %686 = vmatprep.subr.bf16.mxu0 %v3061_v0  ;;  %v3140_v0 = vld [vmem:[#allocation7 + $0x3f4] ss:$28 sps:$4 sm:$0xff]  }
  0xd4   :  { %687 = vmatpush2.bf16.msra.mxu0 %v3059_v1  ;;  %v3135_v1 = vld [vmem:[#allocation7 + $0x70] ss:$28 sps:$4 sm:$0xff]  }
  0xd5   :  { %688 = vmatprep.subr.bf16.mxu0 %v3067_v2  ;;  %v3138_v2 = vld [vmem:[#allocation7 + $0x3f0] ss:$28 sps:$4 sm:$0xff]  }
  0xd8   :  { %689 = vmatpush2.bf16.msra.mxu0 %v3065_v3  ;;  %v3143_v3 = vld [vmem:[#allocation7 + $0x3c] ss:$28 sps:$4 sm:$0xff]  }
  0xd9   :  { %690 = vmatprep.subr.bf16.mxu0 %v3073_v4  ;;  %v3146_v4 = vld [vmem:[#allocation7 + $0x3bc] ss:$28 sps:$4 sm:$0xff]  }
  0xdc   :  { %691 = vmatpush2.bf16.msra.mxu0 %v3071_v5  ;;  %v3141_v5 = vld [vmem:[#allocation7 + $0x38] ss:$28 sps:$4 sm:$0xff]  }
  0xdd   :  { %692 = vmatprep.subr.bf16.mxu0 %v3079_v6  ;;  %v3144_v6 = vld [vmem:[#allocation7 + $0x3b8] ss:$28 sps:$4 sm:$0xff]  }
  0xe0   :  { %693 = vmatpush2.bf16.msra.mxu0 %v3077_v7  ;;  %v3149_v7 = vld [vmem:[#allocation7 + $0x4] ss:$28 sps:$4 sm:$0xff]  }
  0xe1   :  { %694 = vmatprep.subr.bf16.mxu0 %v3085_v8  ;;  %v3152_v8 = vld [vmem:[#allocation7 + $0x384] ss:$28 sps:$4 sm:$0xff]  }
  0xe4   :  { %695 = vmatpush2.bf16.msra.mxu0 %v3083_v9  ;;  %v3147_v9 = vld [vmem:[#allocation7] ss:$28 sps:$4 sm:$0xff]  }
  0xe5   :  { %696 = vmatprep.subr.bf16.mxu0 %v3091_v11  ;;  %v3155_v11 = vld [vmem:[#allocation7 + $0x34c] ss:$28 sps:$4 sm:$0xff]  }
  0xe8   :  { %697 = vmatpush2.bf16.msra.mxu0 %v3089_v12  ;;  %v3158_v12 = vld [vmem:[#allocation7 + $0x6cc] ss:$28 sps:$4 sm:$0xff]  }
  0xe9   :  { %698 = vmatprep.subr.bf16.mxu0 %v3097_v15  ;;  %v3161_v15 = vld [vmem:[#allocation7 + $0x314] ss:$28 sps:$4 sm:$0xff]  }
  0xec   :  { %699 = vmatpush2.bf16.msra.mxu0 %v3095_v16  ;;  %v3164_v16 = vld [vmem:[#allocation7 + $0x694] ss:$28 sps:$4 sm:$0xff]  }
  0xed   :  { %700 = vmatprep.subr.bf16.mxu0 %v3103_v19  ;;  %v3167_v19 = vld [vmem:[#allocation7 + $0x2dc] ss:$28 sps:$4 sm:$0xff]  }
  0xf0   :  { %701 = vmatpush2.bf16.msra.mxu0 %v3101_v20  ;;  %v3170_v20 = vld [vmem:[#allocation7 + $0x65c] ss:$28 sps:$4 sm:$0xff]  }
  0xf1   :  { %2213 = vmatprep.subr.bf16.mxu0 %v3110_v23  ;;  %v3173_v23 = vld [vmem:[#allocation7 + $0x2a4] ss:$28 sps:$4 sm:$0xff]  }
 0x173   :  { %v206_v29 = vpop.f32.mrf.mxu0 }
 0x174   :  { %v207_v36 = vadd.f32 %v206_v29, %v121_v31  ;;  %v3174_v29 = vld [vmem:[#allocation7 + $0x620] ss:$28 sps:$4 sm:$0xff]  }
 0x175   :  { %v208_v32 = vpop.f32.mrf.mxu0 }
 0x176   :  { %v209_v34 = vadd.f32 %v208_v32, %v125_v30  ;;  %v215_v42 = vmax.f32 %v207_v36, 0.0  ;;  %v3177_v32 = vld [vmem:[#allocation7 + $0x268] ss:$28 sps:$4 sm:$0xff]   ;;  %v3183_v36 = vld [vmem:[#allocation7 + $0x230] ss:$28 sps:$4 sm:$0xff]  }
 0x177   :  { %v210_v33 = vpop.f32.mrf.mxu0 }
 0x178   :  { %v211_v35 = vadd.f32 %v210_v33, %v121_v31  ;;  %v216_v40 = vmax.f32 %v209_v34, 0.0  ;;  %v3182_v31 = vld [vmem:[#allocation7 + $0x5ec] ss:$28 sps:$4 sm:$0xff]   ;;  %v3185_v34 = vld [vmem:[#allocation7 + $0x234] ss:$28 sps:$4 sm:$0xff]  }
 0x179   :  { %v212_v37 = vpop.f32.mrf.mxu0  ;;  %v3180_v33 = vld [vmem:[#allocation7 + $0x5e8] ss:$28 sps:$4 sm:$0xff]  }
 0x17a   :  { %v213_v38 = vadd.f32 %v212_v37, %v125_v30  ;;  %v217_v39 = vmax.f32 %v211_v35, 0.0  ;;  %v3179_v30 = vld [vmem:[#allocation7 + $0x26c] ss:$28 sps:$4 sm:$0xff]   ;;  %v3188_v35 = vld [vmem:[#allocation7 + $0x5b4] ss:$28 sps:$4 sm:$0xff]  }
 0x17b   :  { %v3186_v37 = vld [vmem:[#allocation7 + $0x5b0] ss:$28 sps:$4 sm:$0xff]  }
 0x17c   :  { %v218_v41 = vmax.f32 %v213_v38, 0.0  ;;  %v219_v46 = vpack.c.bf16 %v217_v39, %v215_v42  ;;  %v3191_v38 = vld [vmem:[#allocation7 + $0x1fc] ss:$28 sps:$4 sm:$0xff]   ;;  %v3197_v42 = vld [vmem:[#allocation7 + $0x1c4] ss:$28 sps:$4 sm:$0xff]  }
 0x17d   :  { %v3194_v39 = vld [vmem:[#allocation7 + $0x57c] ss:$28 sps:$4 sm:$0xff]  }
 0x17e   :  { %v220_v43 = vpack.c.bf16 %v218_v41, %v216_v40  ;;  %v3189_v40 = vld [vmem:[#allocation7 + $0x1f8] ss:$28 sps:$4 sm:$0xff]  }
 0x17f   :  { %v3192_v41 = vld [vmem:[#allocation7 + $0x578] ss:$28 sps:$4 sm:$0xff]  }
 0x180   :  { %659 = vmatprep.mubr.bf16.mxu1 %v220_v43  ;;  %702 = vmatprep.mubr.bf16.mxu0 %v220_v43  ;;  %v3200_v43 = vld [vmem:[#allocation7 + $0x544] ss:$28 sps:$4 sm:$0xff]  }
 0x181   :  { %660 = vmatmul.mubr.bf16.vlgmr.msra.gmra.mxu1 %v219_v46  ;;  %703 = vmatmul.mubr.bf16.vlgmr.msra.gmra.mxu0 %v219_v46  ;;  %v3203_v46 = vld [vmem:[#allocation7 + $0x194] ss:$28 sps:$4 sm:$0xff]  }
 0x182   :  { %2171 = vmatpush1.bf16.msra.mxu1 %v3105_v44  ;;  %2214 = vmatpush1.bf16.msra.mxu0 %v3108_v45  ;;  %v3195_v44 = vld [vmem:[#allocation7 + $0x1c0] ss:$28 sps:$4 sm:$0xff]  }
 0x183   :  { %2172 = vmatprep.subr.bf16.mxu1 %v3113_v47  ;;  %2215 = vmatprep.subr.bf16.mxu0 %v3116_v48  ;;  %v3198_v45 = vld [vmem:[#allocation7 + $0x540] ss:$28 sps:$4 sm:$0xff]   ;;  %v3206_v47 = vld [vmem:[#allocation7 + $0x514] ss:$28 sps:$4 sm:$0xff]   ;;  %v301_v48 = vsub.s32 3, %v3651_v25 }
 0x186   :  { %2173 = vmatpush1.bf16.msra.mxu1 %v3111_v49  ;;  %2216 = vmatpush1.bf16.msra.mxu0 %v3114_v50  ;;  %v297_v49 = vsub.s32 2, %v3651_v25  ;;  %v285_v50 = vld [vmem:[%s3729_s6] sm:$0xf] }
 0x187   :  { %2174 = vmatprep.subr.bf16.mxu1 %v3119_v51  ;;  %2217 = vmatprep.subr.bf16.mxu0 %v3122_v52 }
 0x18a   :  { %2175 = vmatpush1.bf16.msra.mxu1 %v3117_v53  ;;  %2218 = vmatpush1.bf16.msra.mxu0 %v3120_v54  ;;  %v294_v53 = vrot.slane %v285_v50, %v3654_v26  ;;  %v302_v54 = vrot.slane %v285_v50, %v301_v48 }
 0x18b   :  { %2176 = vmatprep.subr.bf16.mxu1 %v3125_v55  ;;  %2219 = vmatprep.subr.bf16.mxu0 %v3128_v56  ;;  %v290_v55 = vrot.slane %v285_v50, %v3657_v27  ;;  %v298_v56 = vrot.slane %v285_v50, %v297_v49  ;;  %v3245_v50 = vld [vmem:[#allocation7 + $0xc] ss:$28 sps:$4 sm:$0xff]  }
 0x18e   :  { %2177 = vmatpush1.bf16.msra.mxu1 %v3123_v57  ;;  %2220 = vmatpush1.bf16.msra.mxu0 %v3126_v58 }
 0x18f   :  { %2178 = vmatprep.subr.bf16.mxu1 %v3131_v59  ;;  %2221 = vmatprep.subr.bf16.mxu0 %v3134_v60 }
 0x192   :  { %2179 = vmatpush1.bf16.msra.mxu1 %v3129_v61  ;;  %2222 = vmatpush1.bf16.msra.mxu0 %v3132_v62 }
 0x193   :  { %2180 = vmatprep.subr.bf16.mxu1 %v3137_v63  ;;  %2223 = vmatprep.subr.bf16.mxu0 %v3140_v0 }
 0x196   :  { %2181 = vmatpush1.bf16.msra.mxu1 %v3135_v1  ;;  %2224 = vmatpush1.bf16.msra.mxu0 %v3138_v2 }
 0x197   :  { %2182 = vmatprep.subr.bf16.mxu1 %v3143_v3  ;;  %2225 = vmatprep.subr.bf16.mxu0 %v3146_v4 }
 0x19a   :  { %2183 = vmatpush1.bf16.msra.mxu1 %v3141_v5  ;;  %2226 = vmatpush1.bf16.msra.mxu0 %v3144_v6 }
 0x19b   :  { %2184 = vmatprep.subr.bf16.mxu1 %v3149_v7  ;;  %2227 = vmatprep.subr.bf16.mxu0 %v3152_v8 }
 0x19e   :  { %2185 = vmatpush1.bf16.msra.mxu1 %v3147_v9  ;;  %2228 = vmatpush1.bf16.msra.mxu0 %v3150_v10 }
 0x19f   :  { %2186 = vmatprep.subr.bf16.mxu1 %v3155_v11  ;;  %2229 = vmatprep.subr.bf16.mxu0 %v3158_v12 }
 0x1a2   :  { %2187 = vmatpush2.bf16.msra.mxu1 %v3153_v13  ;;  %2230 = vmatpush2.bf16.msra.mxu0 %v3156_v14 }
 0x1a3   :  { %2188 = vmatprep.subr.bf16.mxu1 %v3161_v15  ;;  %2231 = vmatprep.subr.bf16.mxu0 %v3164_v16 }
 0x1a6   :  { %2189 = vmatpush2.bf16.msra.mxu1 %v3159_v17  ;;  %2232 = vmatpush2.bf16.msra.mxu0 %v3162_v18  ;;  %v3201_v17 = vld [vmem:[#allocation7 + $0x190] ss:$28 sps:$4 sm:$0xff]  }
 0x1a7   :  { %2190 = vmatprep.subr.bf16.mxu1 %v3167_v19  ;;  %2233 = vmatprep.subr.bf16.mxu0 %v3170_v20  ;;  %v3204_v18 = vld [vmem:[#allocation7 + $0x510] ss:$28 sps:$4 sm:$0xff]  }
 0x1aa   :  { %2191 = vmatpush2.bf16.msra.mxu1 %v3165_v21  ;;  %2234 = vmatpush2.bf16.msra.mxu0 %v3168_v22  ;;  %v3209_v21 = vld [vmem:[#allocation7 + $0x15c] ss:$28 sps:$4 sm:$0xff]  }
 0x1ab   :  { %2192 = vmatprep.subr.bf16.mxu1 %v3173_v23  ;;  %2235 = vmatprep.subr.bf16.mxu0 %v3176_v24  ;;  %v3212_v22 = vld [vmem:[#allocation7 + $0x4dc] ss:$28 sps:$4 sm:$0xff]  }
 0x1ac   :  { %v3207_v23 = vld [vmem:[#allocation7 + $0x158] ss:$28 sps:$4 sm:$0xff]  }
 0x1ad   :  { %v3210_v24 = vld [vmem:[#allocation7 + $0x4d8] ss:$28 sps:$4 sm:$0xff]  }
 0x1ae   :  { %2193 = vmatpush2.bf16.msra.mxu1 %v3171_v28  ;;  %2236 = vmatpush2.bf16.msra.mxu0 %v3174_v29  ;;  %v3215_v28 = vld [vmem:[#allocation7 + $0x124] ss:$28 sps:$4 sm:$0xff]  }
 0x1af   :  { %2194 = vmatprep.subr.bf16.mxu1 %v3179_v30  ;;  %2237 = vmatprep.subr.bf16.mxu0 %v3182_v31  ;;  %v3218_v29 = vld [vmem:[#allocation7 + $0x4a4] ss:$28 sps:$4 sm:$0xff]  }
 0x1b0   :  { %v3213_v30 = vld [vmem:[#allocation7 + $0x120] ss:$28 sps:$4 sm:$0xff]  }
 0x1b1   :  { %v3216_v31 = vld [vmem:[#allocation7 + $0x4a0] ss:$28 sps:$4 sm:$0xff]  }
 0x1b2   :  { %2195 = vmatpush2.bf16.msra.mxu1 %v3177_v32  ;;  %2238 = vmatpush2.bf16.msra.mxu0 %v3180_v33  ;;  %v3221_v32 = vld [vmem:[#allocation7 + $0xec] ss:$28 sps:$4 sm:$0xff]  }
 0x1b3   :  { %2196 = vmatprep.subr.bf16.mxu1 %v3185_v34  ;;  %2239 = vmatprep.subr.bf16.mxu0 %v3188_v35  ;;  %v3224_v33 = vld [vmem:[#allocation7 + $0x46c] ss:$28 sps:$4 sm:$0xff]  }
 0x1b4   :  { %v3219_v34 = vld [vmem:[#allocation7 + $0xe8] ss:$28 sps:$4 sm:$0xff]  }
 0x1b5   :  { %v3222_v35 = vld [vmem:[#allocation7 + $0x468] ss:$28 sps:$4 sm:$0xff]  }
 0x1b6   :  { %2197 = vmatpush2.bf16.msra.mxu1 %v3183_v36  ;;  %2240 = vmatpush2.bf16.msra.mxu0 %v3186_v37  ;;  %v3227_v36 = vld [vmem:[#allocation7 + $0xb4] ss:$28 sps:$4 sm:$0xff]  }
 0x1b7   :  { %2198 = vmatprep.subr.bf16.mxu1 %v3191_v38  ;;  %2241 = vmatprep.subr.bf16.mxu0 %v3194_v39  ;;  %v3230_v37 = vld [vmem:[#allocation7 + $0x434] ss:$28 sps:$4 sm:$0xff]  }
 0x1b8   :  { %v3225_v38 = vld [vmem:[#allocation7 + $0xb0] ss:$28 sps:$4 sm:$0xff]  }
 0x1b9   :  { %v3228_v39 = vld [vmem:[#allocation7 + $0x430] ss:$28 sps:$4 sm:$0xff]  }
 0x1ba   :  { %2199 = vmatpush2.bf16.msra.mxu1 %v3189_v40  ;;  %2242 = vmatpush2.bf16.msra.mxu0 %v3192_v41  ;;  %v3233_v40 = vld [vmem:[#allocation7 + $0x7c] ss:$28 sps:$4 sm:$0xff]  }
 0x1bb   :  { %2200 = vmatprep.subr.bf16.mxu1 %v3197_v42  ;;  %2243 = vmatprep.subr.bf16.mxu0 %v3200_v43  ;;  %v3236_v41 = vld [vmem:[#allocation7 + $0x3fc] ss:$28 sps:$4 sm:$0xff]  }
 0x1bc   :  { %v3231_v42 = vld [vmem:[#allocation7 + $0x78] ss:$28 sps:$4 sm:$0xff]  }
 0x1bd   :  { %v3234_v43 = vld [vmem:[#allocation7 + $0x3f8] ss:$28 sps:$4 sm:$0xff]  }
 0x1be   :  { %2201 = vmatpush2.bf16.msra.mxu1 %v3195_v44  ;;  %2244 = vmatpush2.bf16.msra.mxu0 %v3198_v45  ;;  %v3239_v44 = vld [vmem:[#allocation7 + $0x44] ss:$28 sps:$4 sm:$0xff]  }
 0x1bf   :  { %2256 = vmatprep.subr.bf16.mxu1 %v3203_v46  ;;  %2299 = vmatprep.subr.bf16.mxu0 %v3206_v47  ;;  %v3242_v45 = vld [vmem:[#allocation7 + $0x3c4] ss:$28 sps:$4 sm:$0xff]  }
 0x1c0   :  { %v3237_v46 = vld [vmem:[#allocation7 + $0x40] ss:$28 sps:$4 sm:$0xff]  }
 0x1c1   :  { %v3240_v47 = vld [vmem:[#allocation7 + $0x3c0] ss:$28 sps:$4 sm:$0xff]  }
 0x241   :  { %v661_v51 = vpop.f32.mrf.mxu1  ;;  %v704_v52 = vpop.f32.mrf.mxu0 }
 0x242   :  { %v662_v1 = vadd.f32 %v661_v51, %v290_v55  ;;  %v705_v2 = vadd.f32 %v704_v52, %v298_v56  ;;  %v3248_v51 = vld [vmem:[#allocation7 + $0x38c] ss:$28 sps:$4 sm:$0xff]  }
 0x243   :  { %v663_v57 = vpop.f32.mrf.mxu1  ;;  %v706_v58 = vpop.f32.mrf.mxu0  ;;  %v3243_v52 = vld [vmem:[#allocation7 + $0x8] ss:$28 sps:$4 sm:$0xff]  }
 0x244   :  { %v664_v61 = vadd.f32 %v663_v57, %v294_v53  ;;  %v707_v62 = vadd.f32 %v706_v58, %v302_v54  ;;  %v713_v13 = vmax.f32 %v662_v1, 0.0  ;;  %v715_v14 = vmax.f32 %v705_v2, 0.0  ;;  %v3252_v57 = vld [vmem:[#allocation7 + $0x6d0] ss:$28 sps:$4 sm:$0xff]   ;;  %v3257_v58 = vld [vmem:[#allocation7 + $0x31c] ss:$28 sps:$4 sm:$0xff]  }
 0x245   :  { %v665_v59 = vpop.f32.mrf.mxu1  ;;  %v708_v60 = vpop.f32.mrf.mxu0  ;;  %v3264_v1 = vld [vmem:[#allocation7 + $0x660] ss:$28 sps:$4 sm:$0xff]   ;;  %v3269_v2 = vld [vmem:[#allocation7 + $0x2ac] ss:$28 sps:$4 sm:$0xff]  }
 0x246   :  { %v666_v63 = vadd.f32 %v665_v59, %v290_v55  ;;  %v709_v0 = vadd.f32 %v708_v60, %v298_v56  ;;  %v714_v9 = vmax.f32 %v664_v61, 0.0  ;;  %v716_v10 = vmax.f32 %v707_v62, 0.0  ;;  %v3254_v55 = vld [vmem:[#allocation7 + $0x6d4] ss:$28 sps:$4 sm:$0xff]   ;;  %v3260_v59 = vld [vmem:[#allocation7 + $0x69c] ss:$28 sps:$4 sm:$0xff]  }
 0x247   :  { %v667_v3 = vpop.f32.mrf.mxu1  ;;  %v710_v4 = vpop.f32.mrf.mxu0  ;;  %v3249_v56 = vld [vmem:[#allocation7 + $0x350] ss:$28 sps:$4 sm:$0xff]   ;;  %v3255_v60 = vld [vmem:[#allocation7 + $0x318] ss:$28 sps:$4 sm:$0xff]   ;;  %v3263_v62 = vld [vmem:[#allocation7 + $0x2e4] ss:$28 sps:$4 sm:$0xff]  }
 0x248   :  { %v668_v5 = vadd.f32 %v667_v3, %v294_v53  ;;  %v711_v6 = vadd.f32 %v710_v4, %v302_v54  ;;  %v717_v7 = vmax.f32 %v666_v63, 0.0  ;;  %v719_v8 = vmax.f32 %v709_v0, 0.0  ;;  %v3246_v53 = vld [vmem:[#allocation7 + $0x388] ss:$28 sps:$4 sm:$0xff]   ;;  %v3251_v54 = vld [vmem:[#allocation7 + $0x354] ss:$28 sps:$4 sm:$0xff]  }
 0x249   :  { %v3258_v61 = vld [vmem:[#allocation7 + $0x698] ss:$28 sps:$4 sm:$0xff]   ;;  %v3266_v63 = vld [vmem:[#allocation7 + $0x664] ss:$28 sps:$4 sm:$0xff]   ;;  %v3272_v3 = vld [vmem:[#allocation7 + $0x62c] ss:$28 sps:$4 sm:$0xff]  }
 0x24a   :  { %v718_v11 = vmax.f32 %v668_v5, 0.0  ;;  %v720_v12 = vmax.f32 %v711_v6, 0.0  ;;  %v3679_v19 = vpack.c.bf16 %v717_v7, %v713_v13  ;;  %v3681_v20 = vpack.c.bf16 %v719_v8, %v715_v14  ;;  %v3261_v0 = vld [vmem:[#allocation7 + $0x2e0] ss:$28 sps:$4 sm:$0xff]   ;;  %v3267_v4 = vld [vmem:[#allocation7 + $0x2a8] ss:$28 sps:$4 sm:$0xff]  }
 0x24b   :  { %v3270_v5 = vld [vmem:[#allocation7 + $0x628] ss:$28 sps:$4 sm:$0xff]   ;;  %v3275_v6 = vld [vmem:[#allocation7 + $0x274] ss:$28 sps:$4 sm:$0xff]  }
 0x24c   :  { %v3675_v15 = vpack.c.bf16 %v718_v11, %v714_v9  ;;  %v3677_v16 = vpack.c.bf16 %v720_v12, %v716_v10  ;;  %v3278_v7 = vld [vmem:[#allocation7 + $0x5f4] ss:$28 sps:$4 sm:$0xff]   ;;  %v3281_v10 = vld [vmem:[#allocation7 + $0x23c] ss:$28 sps:$4 sm:$0xff]   ;;  %v3287_v14 = vld [vmem:[#allocation7 + $0x204] ss:$28 sps:$4 sm:$0xff]  }
 0x24d   :  { %v3273_v8 = vld [vmem:[#allocation7 + $0x270] ss:$28 sps:$4 sm:$0xff]   ;;  %v3284_v11 = vld [vmem:[#allocation7 + $0x5bc] ss:$28 sps:$4 sm:$0xff]  }
 0x24e   :  { %2202 = vmatprep.mubr.bf16.mxu1 %v3675_v15  ;;  %2245 = vmatprep.mubr.bf16.mxu0 %v3677_v16  ;;  %v3276_v9 = vld [vmem:[#allocation7 + $0x5f0] ss:$28 sps:$4 sm:$0xff]   ;;  %v3279_v12 = vld [vmem:[#allocation7 + $0x238] ss:$28 sps:$4 sm:$0xff]  }
 0x24f   :  { %2203 = vmatmul.mubr.bf16.vlgmr.msra.gmra.mxu1 %v3679_v19  ;;  %2246 = vmatmul.mubr.bf16.vlgmr.msra.gmra.mxu0 %v3681_v20  ;;  %v3282_v13 = vld [vmem:[#allocation7 + $0x5b8] ss:$28 sps:$4 sm:$0xff]  }
 0x250   :  { %2257 = vmatpush1.bf16.msra.mxu1 %v3201_v17  ;;  %2300 = vmatpush1.bf16.msra.mxu0 %v3204_v18  ;;  %v3290_v17 = vld [vmem:[#allocation7 + $0x584] ss:$28 sps:$4 sm:$0xff]  }
 0x251   :  { %2288 = vmatprep.mubr.bf16.mxu1 %v3675_v15  ;;  %2331 = vmatprep.mubr.bf16.mxu0 %v3677_v16  ;;  %v3285_v18 = vld [vmem:[#allocation7 + $0x200] ss:$28 sps:$4 sm:$0xff]  }
 0x252   :  { %2258 = vmatprep.subr.bf16.mxu1 %v3209_v21  ;;  %2301 = vmatprep.subr.bf16.mxu0 %v3212_v22  ;;  %v3288_v21 = vld [vmem:[#allocation7 + $0x580] ss:$28 sps:$4 sm:$0xff]   ;;  %v3293_v22 = vld [vmem:[#allocation7 + $0x1cc] ss:$28 sps:$4 sm:$0xff]  }
 0x254   :  { %2259 = vmatpush1.bf16.msra.mxu1 %v3207_v23  ;;  %2302 = vmatpush1.bf16.msra.mxu0 %v3210_v24  ;;  %v3296_v23 = vld [vmem:[#allocation7 + $0x54c] ss:$28 sps:$4 sm:$0xff]  }
 0x255   :  { %2260 = vmatprep.subr.bf16.mxu1 %v3215_v28  ;;  %2303 = vmatprep.subr.bf16.mxu0 %v3218_v29  ;;  %v3291_v24 = vld [vmem:[#allocation7 + $0x1c8] ss:$28 sps:$4 sm:$0xff]   ;;  %v3299_v29 = vld [vmem:[#allocation7 + $0x19c] ss:$28 sps:$4 sm:$0xff]  }
 0x256   :  { %v3294_v28 = vld [vmem:[#allocation7 + $0x548] ss:$28 sps:$4 sm:$0xff]  }
 0x258   :  { %2261 = vmatpush1.bf16.msra.mxu1 %v3213_v30  ;;  %2304 = vmatpush1.bf16.msra.mxu0 %v3216_v31  ;;  %v3302_v30 = vld [vmem:[#allocation7 + $0x51c] ss:$28 sps:$4 sm:$0xff]  }
 0x259   :  { %2262 = vmatprep.subr.bf16.mxu1 %v3221_v32  ;;  %2305 = vmatprep.subr.bf16.mxu0 %v3224_v33  ;;  %v3297_v31 = vld [vmem:[#allocation7 + $0x198] ss:$28 sps:$4 sm:$0xff]   ;;  %v3305_v33 = vld [vmem:[#allocation7 + $0x164] ss:$28 sps:$4 sm:$0xff]  }
 0x25a   :  { %v3300_v32 = vld [vmem:[#allocation7 + $0x518] ss:$28 sps:$4 sm:$0xff]  }
 0x25c   :  { %2263 = vmatpush1.bf16.msra.mxu1 %v3219_v34  ;;  %2306 = vmatpush1.bf16.msra.mxu0 %v3222_v35  ;;  %v3308_v34 = vld [vmem:[#allocation7 + $0x4e4] ss:$28 sps:$4 sm:$0xff]  }
 0x25d   :  { %2264 = vmatprep.subr.bf16.mxu1 %v3227_v36  ;;  %2307 = vmatprep.subr.bf16.mxu0 %v3230_v37  ;;  %v3303_v35 = vld [vmem:[#allocation7 + $0x160] ss:$28 sps:$4 sm:$0xff]   ;;  %v3311_v37 = vld [vmem:[#allocation7 + $0x12c] ss:$28 sps:$4 sm:$0xff]  }
 0x25e   :  { %v3306_v36 = vld [vmem:[#allocation7 + $0x4e0] ss:$28 sps:$4 sm:$0xff]  }
 0x260   :  { %2265 = vmatpush1.bf16.msra.mxu1 %v3225_v38  ;;  %2308 = vmatpush1.bf16.msra.mxu0 %v3228_v39  ;;  %v3314_v38 = vld [vmem:[#allocation7 + $0x4ac] ss:$28 sps:$4 sm:$0xff]  }
 0x261   :  { %2266 = vmatprep.subr.bf16.mxu1 %v3233_v40  ;;  %2309 = vmatprep.subr.bf16.mxu0 %v3236_v41  ;;  %v3309_v39 = vld [vmem:[#allocation7 + $0x128] ss:$28 sps:$4 sm:$0xff]   ;;  %v3317_v41 = vld [vmem:[#allocation7 + $0xf4] ss:$28 sps:$4 sm:$0xff]  }
 0x262   :  { %v3312_v40 = vld [vmem:[#allocation7 + $0x4a8] ss:$28 sps:$4 sm:$0xff]  }
 0x264   :  { %2267 = vmatpush1.bf16.msra.mxu1 %v3231_v42  ;;  %2310 = vmatpush1.bf16.msra.mxu0 %v3234_v43  ;;  %v3320_v42 = vld [vmem:[#allocation7 + $0x474] ss:$28 sps:$4 sm:$0xff]  }
 0x265   :  { %2268 = vmatprep.subr.bf16.mxu1 %v3239_v44  ;;  %2311 = vmatprep.subr.bf16.mxu0 %v3242_v45  ;;  %v3315_v43 = vld [vmem:[#allocation7 + $0xf0] ss:$28 sps:$4 sm:$0xff]   ;;  %v3323_v45 = vld [vmem:[#allocation7 + $0xbc] ss:$28 sps:$4 sm:$0xff]  }
 0x266   :  { %v3318_v44 = vld [vmem:[#allocation7 + $0x470] ss:$28 sps:$4 sm:$0xff]  }
 0x268   :  { %2269 = vmatpush1.bf16.msra.mxu1 %v3237_v46  ;;  %2312 = vmatpush1.bf16.msra.mxu0 %v3240_v47  ;;  %v3326_v46 = vld [vmem:[#allocation7 + $0x43c] ss:$28 sps:$4 sm:$0xff]  }
 0x269   :  { %2270 = vmatprep.subr.bf16.mxu1 %v3245_v50  ;;  %2313 = vmatprep.subr.bf16.mxu0 %v3248_v51  ;;  %v3321_v47 = vld [vmem:[#allocation7 + $0xb8] ss:$28 sps:$4 sm:$0xff]   ;;  %v3329_v51 = vld [vmem:[#allocation7 + $0x84] ss:$28 sps:$4 sm:$0xff]  }
 0x26a   :  { %v3324_v50 = vld [vmem:[#allocation7 + $0x438] ss:$28 sps:$4 sm:$0xff]  }
 0x26c   :  { %2271 = vmatpush1.bf16.msra.mxu1 %v3243_v52  ;;  %2314 = vmatpush1.bf16.msra.mxu0 %v3246_v53  ;;  %v3332_v52 = vld [vmem:[#allocation7 + $0x404] ss:$28 sps:$4 sm:$0xff]  }
 0x26d   :  { %2272 = vmatprep.subr.bf16.mxu1 %v3251_v54  ;;  %2315 = vmatprep.subr.bf16.mxu0 %v3254_v55  ;;  %v3327_v53 = vld [vmem:[#allocation7 + $0x80] ss:$28 sps:$4 sm:$0xff]   ;;  %v3335_v55 = vld [vmem:[#allocation7 + $0x4c] ss:$28 sps:$4 sm:$0xff]  }
 0x26e   :  { %v3330_v54 = vld [vmem:[#allocation7 + $0x400] ss:$28 sps:$4 sm:$0xff]  }
 0x270   :  { %2273 = vmatpush2.bf16.msra.mxu1 %v3249_v56  ;;  %2316 = vmatpush2.bf16.msra.mxu0 %v3252_v57  ;;  %v3338_v56 = vld [vmem:[#allocation7 + $0x3cc] ss:$28 sps:$4 sm:$0xff]  }
 0x271   :  { %2274 = vmatprep.subr.bf16.mxu1 %v3257_v58  ;;  %2317 = vmatprep.subr.bf16.mxu0 %v3260_v59  ;;  %v3333_v57 = vld [vmem:[#allocation7 + $0x48] ss:$28 sps:$4 sm:$0xff]   ;;  %v3341_v59 = vld [vmem:[#allocation7 + $0x14] ss:$28 sps:$4 sm:$0xff]  }
 0x272   :  { %v3336_v58 = vld [vmem:[#allocation7 + $0x3c8] ss:$28 sps:$4 sm:$0xff]  }
 0x274   :  { %2275 = vmatpush2.bf16.msra.mxu1 %v3255_v60  ;;  %2318 = vmatpush2.bf16.msra.mxu0 %v3258_v61  ;;  %v3344_v60 = vld [vmem:[#allocation7 + $0x394] ss:$28 sps:$4 sm:$0xff]  }
 0x275   :  { %2276 = vmatprep.subr.bf16.mxu1 %v3263_v62  ;;  %2319 = vmatprep.subr.bf16.mxu0 %v3266_v63  ;;  %v3339_v61 = vld [vmem:[#allocation7 + $0x10] ss:$28 sps:$4 sm:$0xff]   ;;  %v3347_v63 = vld [vmem:[#allocation7 + $0x35c] ss:$28 sps:$4 sm:$0xff]  }
 0x276   :  { %v3342_v62 = vld [vmem:[#allocation7 + $0x390] ss:$28 sps:$4 sm:$0xff]  }
 0x278   :  { %2277 = vmatpush2.bf16.msra.mxu1 %v3261_v0  ;;  %2320 = vmatpush2.bf16.msra.mxu0 %v3264_v1  ;;  %v3350_v0 = vld [vmem:[#allocation7 + $0x6dc] ss:$28 sps:$4 sm:$0xff]  }
 0x279   :  { %2278 = vmatprep.subr.bf16.mxu1 %v3269_v2  ;;  %2321 = vmatprep.subr.bf16.mxu0 %v3272_v3  ;;  %v3345_v1 = vld [vmem:[#allocation7 + $0x358] ss:$28 sps:$4 sm:$0xff]   ;;  %v3353_v3 = vld [vmem:[#allocation7 + $0x324] ss:$28 sps:$4 sm:$0xff]  }
 0x27a   :  { %v3348_v2 = vld [vmem:[#allocation7 + $0x6d8] ss:$28 sps:$4 sm:$0xff]  }
 0x27c   :  { %2279 = vmatpush2.bf16.msra.mxu1 %v3267_v4  ;;  %2322 = vmatpush2.bf16.msra.mxu0 %v3270_v5  ;;  %v3356_v4 = vld [vmem:[#allocation7 + $0x6a4] ss:$28 sps:$4 sm:$0xff]  }
 0x27d   :  { %2280 = vmatprep.subr.bf16.mxu1 %v3275_v6  ;;  %2323 = vmatprep.subr.bf16.mxu0 %v3278_v7  ;;  %v3351_v5 = vld [vmem:[#allocation7 + $0x320] ss:$28 sps:$4 sm:$0xff]   ;;  %v3359_v7 = vld [vmem:[#allocation7 + $0x2ec] ss:$28 sps:$4 sm:$0xff]  }
 0x27e   :  { %v3354_v6 = vld [vmem:[#allocation7 + $0x6a0] ss:$28 sps:$4 sm:$0xff]  }
 0x280   :  { %2281 = vmatpush2.bf16.msra.mxu1 %v3273_v8  ;;  %2324 = vmatpush2.bf16.msra.mxu0 %v3276_v9  ;;  %v3362_v8 = vld [vmem:[#allocation7 + $0x66c] ss:$28 sps:$4 sm:$0xff]  }
 0x281   :  { %2282 = vmatprep.subr.bf16.mxu1 %v3281_v10  ;;  %2325 = vmatprep.subr.bf16.mxu0 %v3284_v11  ;;  %v3357_v9 = vld [vmem:[#allocation7 + $0x2e8] ss:$28 sps:$4 sm:$0xff]   ;;  %v3365_v11 = vld [vmem:[#allocation7 + $0x2b4] ss:$28 sps:$4 sm:$0xff]  }
 0x282   :  { %v3360_v10 = vld [vmem:[#allocation7 + $0x668] ss:$28 sps:$4 sm:$0xff]  }
 0x284   :  { %2283 = vmatpush2.bf16.msra.mxu1 %v3279_v12  ;;  %2326 = vmatpush2.bf16.msra.mxu0 %v3282_v13  ;;  %v3368_v12 = vld [vmem:[#allocation7 + $0x634] ss:$28 sps:$4 sm:$0xff]  }
 0x285   :  { %2284 = vmatprep.subr.bf16.mxu1 %v3287_v14  ;;  %2327 = vmatprep.subr.bf16.mxu0 %v3290_v17  ;;  %v3363_v13 = vld [vmem:[#allocation7 + $0x2b0] ss:$28 sps:$4 sm:$0xff]   ;;  %v3371_v17 = vld [vmem:[#allocation7 + $0x27c] ss:$28 sps:$4 sm:$0xff]  }
 0x286   :  { %v3366_v14 = vld [vmem:[#allocation7 + $0x630] ss:$28 sps:$4 sm:$0xff]  }
 0x288   :  { %2285 = vmatpush2.bf16.msra.mxu1 %v3285_v18  ;;  %2328 = vmatpush2.bf16.msra.mxu0 %v3288_v21  ;;  %v3374_v18 = vld [vmem:[#allocation7 + $0x5fc] ss:$28 sps:$4 sm:$0xff]  }
 0x289   :  { %2286 = vmatprep.subr.bf16.mxu1 %v3293_v22  ;;  %2329 = vmatprep.subr.bf16.mxu0 %v3296_v23  ;;  %v3369_v21 = vld [vmem:[#allocation7 + $0x278] ss:$28 sps:$4 sm:$0xff]   ;;  %v3377_v23 = vld [vmem:[#allocation7 + $0x244] ss:$28 sps:$4 sm:$0xff]  }
 0x28a   :  { %v3372_v22 = vld [vmem:[#allocation7 + $0x5f8] ss:$28 sps:$4 sm:$0xff]  }
 0x28c   :  { %2287 = vmatpush2.bf16.msra.mxu1 %v3291_v24  ;;  %2330 = vmatpush2.bf16.msra.mxu0 %v3294_v28  ;;  %v3380_v24 = vld [vmem:[#allocation7 + $0x5c4] ss:$28 sps:$4 sm:$0xff]  }
 0x28d   :  { %2342 = vmatprep.subr.bf16.mxu1 %v3299_v29  ;;  %2385 = vmatprep.subr.bf16.mxu0 %v3302_v30  ;;  %v3375_v28 = vld [vmem:[#allocation7 + $0x240] ss:$28 sps:$4 sm:$0xff]   ;;  %v3383_v30 = vld [vmem:[#allocation7 + $0x20c] ss:$28 sps:$4 sm:$0xff]  }
 0x28e   :  { %v3378_v29 = vld [vmem:[#allocation7 + $0x5c0] ss:$28 sps:$4 sm:$0xff]  }
 0x28f   :  { %2289 = vmatmul.mubr.bf16.vlgmr.msra.gmra.mxu1 %v3679_v19  ;;  %2332 = vmatmul.mubr.bf16.vlgmr.msra.gmra.mxu0 %v3681_v20 }
 0x290   :  { %2343 = vmatpush1.bf16.msra.mxu1 %v3297_v31  ;;  %2374 = vmatprep.mubr.bf16.mxu1 %v3675_v15  ;;  %v3386_v31 = vld [vmem:[#allocation7 + $0x58c] ss:$28 sps:$4 sm:$0xff]  }
 0x291   :  { %2386 = vmatpush1.bf16.msra.mxu0 %v3300_v32  ;;  %2417 = vmatprep.mubr.bf16.mxu0 %v3677_v16  ;;  %v3381_v32 = vld [vmem:[#allocation7 + $0x208] ss:$28 sps:$4 sm:$0xff]  }
 0x292   :  { %2344 = vmatprep.subr.bf16.mxu1 %v3305_v33  ;;  %2387 = vmatprep.subr.bf16.mxu0 %v3308_v34  ;;  %v3384_v33 = vld [vmem:[#allocation7 + $0x588] ss:$28 sps:$4 sm:$0xff]   ;;  %v3389_v34 = vld [vmem:[#allocation7 + $0x1d4] ss:$28 sps:$4 sm:$0xff]  }
 0x294   :  { %2345 = vmatpush1.bf16.msra.mxu1 %v3303_v35  ;;  %v3392_v35 = vld [vmem:[#allocation7 + $0x554] ss:$28 sps:$4 sm:$0xff]  }
 0x295   :  { %2388 = vmatpush1.bf16.msra.mxu0 %v3306_v36  ;;  %2346 = vmatprep.subr.bf16.mxu1 %v3311_v37  ;;  %v3387_v36 = vld [vmem:[#allocation7 + $0x1d0] ss:$28 sps:$4 sm:$0xff]  }
 0x296   :  { %2389 = vmatprep.subr.bf16.mxu0 %v3314_v38  ;;  %v3390_v37 = vld [vmem:[#allocation7 + $0x550] ss:$28 sps:$4 sm:$0xff]   ;;  %v3393_v38 = vld [vmem:[#allocation7 + $0x360] ss:$28 sps:$4 sm:$0xff]  }
 0x298   :  { %2347 = vmatpush1.bf16.msra.mxu1 %v3309_v39  ;;  %v3394_v39 = vld [vmem:[#allocation7 + $0x6e0] ss:$28 sps:$4 sm:$0xff]  }
 0x299   :  { %2390 = vmatpush1.bf16.msra.mxu0 %v3312_v40  ;;  %2348 = vmatprep.subr.bf16.mxu1 %v3317_v41  ;;  %v3395_v40 = vld [vmem:[#allocation7 + $0x1a0] ss:$28 sps:$4 sm:$0xff]  }
 0x29a   :  { %2391 = vmatprep.subr.bf16.mxu0 %v3320_v42  ;;  %v3396_v41 = vld [vmem:[#allocation7 + $0x520] ss:$28 sps:$4 sm:$0xff]   ;;  %v3397_v42 = vld [vmem:[#allocation7 + $0x328] ss:$28 sps:$4 sm:$0xff]  }
 0x29c   :  { %2349 = vmatpush1.bf16.msra.mxu1 %v3315_v43  ;;  %v3398_v43 = vld [vmem:[#allocation7 + $0x6a8] ss:$28 sps:$4 sm:$0xff]  }
 0x29d   :  { %2392 = vmatpush1.bf16.msra.mxu0 %v3318_v44  ;;  %2350 = vmatprep.subr.bf16.mxu1 %v3323_v45  ;;  %v3399_v44 = vld [vmem:[#allocation7 + $0x168] ss:$28 sps:$4 sm:$0xff]  }
 0x29e   :  { %2393 = vmatprep.subr.bf16.mxu0 %v3326_v46  ;;  %v3400_v45 = vld [vmem:[#allocation7 + $0x4e8] ss:$28 sps:$4 sm:$0xff]   ;;  %v3401_v46 = vld [vmem:[#allocation7 + $0x2f0] ss:$28 sps:$4 sm:$0xff]  }
 0x2a0   :  { %2351 = vmatpush1.bf16.msra.mxu1 %v3321_v47  ;;  %v3402_v47 = vld [vmem:[#allocation7 + $0x670] ss:$28 sps:$4 sm:$0xff]  }
 0x2a1   :  { %2394 = vmatpush1.bf16.msra.mxu0 %v3324_v50  ;;  %2352 = vmatprep.subr.bf16.mxu1 %v3329_v51  ;;  %v3403_v50 = vld [vmem:[#allocation7 + $0x130] ss:$28 sps:$4 sm:$0xff]  }
 0x2a2   :  { %2395 = vmatprep.subr.bf16.mxu0 %v3332_v52  ;;  %v3404_v51 = vld [vmem:[#allocation7 + $0x4b0] ss:$28 sps:$4 sm:$0xff]   ;;  %v3405_v52 = vld [vmem:[#allocation7 + $0x2b8] ss:$28 sps:$4 sm:$0xff]  }
 0x2a4   :  { %2353 = vmatpush1.bf16.msra.mxu1 %v3327_v53  ;;  %v3406_v53 = vld [vmem:[#allocation7 + $0x638] ss:$28 sps:$4 sm:$0xff]  }
 0x2a5   :  { %2396 = vmatpush1.bf16.msra.mxu0 %v3330_v54  ;;  %2354 = vmatprep.subr.bf16.mxu1 %v3335_v55  ;;  %v3407_v54 = vld [vmem:[#allocation7 + $0xf8] ss:$28 sps:$4 sm:$0xff]   ;;  %v3409_v55 = vld [vmem:[#allocation7 + $0x280] ss:$28 sps:$4 sm:$0xff]  }
 0x2a6   :  { %2397 = vmatprep.subr.bf16.mxu0 %v3338_v56  ;;  %v3410_v56 = vld [vmem:[#allocation7 + $0x600] ss:$28 sps:$4 sm:$0xff]  }
 0x2a8   :  { %2355 = vmatpush1.bf16.msra.mxu1 %v3333_v57  ;;  %v3412_v57 = vld [vmem:[#allocation7 + $0x440] ss:$28 sps:$4 sm:$0xff]  }
 0x2a9   :  { %2398 = vmatpush1.bf16.msra.mxu0 %v3336_v58  ;;  %2356 = vmatprep.subr.bf16.mxu1 %v3341_v59  ;;  %v3413_v58 = vld [vmem:[#allocation7 + $0x248] ss:$28 sps:$4 sm:$0xff]  }
 0x2aa   :  { %2399 = vmatprep.subr.bf16.mxu0 %v3344_v60  ;;  %v3414_v59 = vld [vmem:[#allocation7 + $0x5c8] ss:$28 sps:$4 sm:$0xff]  }
 0x2ab   :  { %v3415_v60 = vld [vmem:[#allocation7 + $0x88] ss:$28 sps:$4 sm:$0xff]  }
 0x2ac   :  { %2357 = vmatpush1.bf16.msra.mxu1 %v3339_v61  ;;  %v3416_v61 = vld [vmem:[#allocation7 + $0x408] ss:$28 sps:$4 sm:$0xff]  }
 0x2ad   :  { %2400 = vmatpush1.bf16.msra.mxu0 %v3342_v62  ;;  %2358 = vmatprep.subr.bf16.mxu1 %v3347_v63  ;;  %v3417_v62 = vld [vmem:[#allocation7 + $0x210] ss:$28 sps:$4 sm:$0xff]  }
 0x2ae   :  { %2401 = vmatprep.subr.bf16.mxu0 %v3350_v0  ;;  %v3418_v63 = vld [vmem:[#allocation7 + $0x590] ss:$28 sps:$4 sm:$0xff]  }
 0x2af   :  { %v3419_v0 = vld [vmem:[#allocation7 + $0x50] ss:$28 sps:$4 sm:$0xff]  }
 0x2b0   :  { %2359 = vmatpush2.bf16.msra.mxu1 %v3345_v1  ;;  %v3420_v1 = vld [vmem:[#allocation7 + $0x3d0] ss:$28 sps:$4 sm:$0xff]  }
 0x2b1   :  { %2402 = vmatpush2.bf16.msra.mxu0 %v3348_v2  ;;  %2360 = vmatprep.subr.bf16.mxu1 %v3353_v3  ;;  %v3421_v2 = vld [vmem:[#allocation7 + $0x1d8] ss:$28 sps:$4 sm:$0xff]  }
 0x2b2   :  { %2403 = vmatprep.subr.bf16.mxu0 %v3356_v4  ;;  %v3422_v3 = vld [vmem:[#allocation7 + $0x558] ss:$28 sps:$4 sm:$0xff]  }
 0x2b3   :  { %v3423_v4 = vld [vmem:[#allocation7 + $0x18] ss:$28 sps:$4 sm:$0xff]  }
 0x2b4   :  { %2361 = vmatpush2.bf16.msra.mxu1 %v3351_v5  ;;  %v3424_v5 = vld [vmem:[#allocation7 + $0x398] ss:$28 sps:$4 sm:$0xff]  }
 0x2b5   :  { %2404 = vmatpush2.bf16.msra.mxu0 %v3354_v6  ;;  %2362 = vmatprep.subr.bf16.mxu1 %v3359_v7  ;;  %v3702_v6 = vld [vmem:[%s3731_s8] sm:$0xff]  ;;  %s3577_s8 = smov [#allocation8]  }
 0x2b6   :  { %2405 = vmatprep.subr.bf16.mxu0 %v3362_v8  ;;  %v986_v7 = vrot.slane %v3702_v6, %v3657_v27  ;;  %v990_v8 = vrot.slane %v3702_v6, %v3654_v26  ;;  %s2613_s15 = sshll.u32 %s3577_s8, 4  ;;  %s2614_s15 = int_to_ptr.vmem [resolvable:$true] %s2613_s15 }
 0x2b7   :  { %s3541_s16 = scalar_lea.vmem %s2614_s15, 1792  ;;  %p3546_p2 = scmp.lt.s32.totalorder %s2614_s15, %s2614_s15 }
 0x2b8   :  { %2363 = vmatpush2.bf16.msra.mxu1 %v3357_v9  ;;  %p3542_p1 = scmp.ne.s32.totalorder %s2614_s15, %s3541_s16  ;;  %p3547_p3 = scmp.lt.s32.totalorder %s3541_s16, %s3541_s16 }
 0x2b9   :  { %2406 = vmatpush2.bf16.msra.mxu0 %v3360_v10  ;;  %2364 = vmatprep.subr.bf16.mxu1 %v3365_v11 }
 0x2ba   :  { %2407 = vmatprep.subr.bf16.mxu0 %v3368_v12  ;;  %p3548_p4 = por %p3547_p3, %p3546_p2 }
 0x2bc   :  { %2365 = vmatpush2.bf16.msra.mxu1 %v3363_v13  ;;  %p3549_p5 = pnand %p3548_p4, %p3542_p1 }
 0x2bd   :  { %2408 = vmatpush2.bf16.msra.mxu0 %v3366_v14  ;;  %2366 = vmatprep.subr.bf16.mxu1 %v3371_v17 }
 0x2be   :  { %2409 = vmatprep.subr.bf16.mxu0 %v3374_v18 }
 0x2c0   :  { %2367 = vmatpush2.bf16.msra.mxu1 %v3369_v21 }
 0x2c1   :  { %2410 = vmatpush2.bf16.msra.mxu0 %v3372_v22  ;;  %2368 = vmatprep.subr.bf16.mxu1 %v3377_v23 }
 0x2c2   :  { %2411 = vmatprep.subr.bf16.mxu0 %v3380_v24 }
 0x2c4   :  { %2369 = vmatpush2.bf16.msra.mxu1 %v3375_v28 }
 0x2c5   :  { %2412 = vmatpush2.bf16.msra.mxu0 %v3378_v29  ;;  %2370 = vmatprep.subr.bf16.mxu1 %v3383_v30 }
 0x2c6   :  { %2413 = vmatprep.subr.bf16.mxu0 %v3386_v31 }
 0x2c8   :  { %2371 = vmatpush2.bf16.msra.mxu1 %v3381_v32 }
 0x2c9   :  { %2414 = vmatpush2.bf16.msra.mxu0 %v3384_v33  ;;  %2372 = vmatprep.subr.bf16.mxu1 %v3389_v34 }
 0x2ca   :  { %2415 = vmatprep.subr.bf16.mxu0 %v3392_v35 }
 0x2cc   :  { %2373 = vmatpush2.bf16.msra.mxu1 %v3387_v36 }
 0x2cd   :  { %2416 = vmatpush2.bf16.msra.mxu0 %v3390_v37  ;;  %2939 = vmatprep.subr.bf16.mxu1 %v3393_v38 }
 0x2ce   :  { %2961 = vmatprep.subr.bf16.mxu0 %v3394_v39 }
 0x2cf   :  { %2375 = vmatmul.mubr.bf16.vlgmr.msra.gmra.mxu1 %v3679_v19 }
 0x2d0   :  { %2418 = vmatmul.mubr.bf16.vlgmr.msra.gmra.mxu0 %v3681_v20  ;;  %2940 = vmatpush3.bf16.msra.mxu1 %v3395_v40 }
 0x2d1   :  { %2460 = vmatprep.mubr.bf16.mxu1 %v3675_v15  ;;  %2962 = vmatpush3.bf16.msra.mxu0 %v3396_v41  ;;  %v3408_v15 = vld [vmem:[#allocation7 + $0x478] ss:$28 sps:$4 sm:$0xff]  }
 0x2d2   :  { %2501 = vmatprep.mubr.bf16.mxu0 %v3677_v16  ;;  %2941 = vmatprep.subr.bf16.mxu1 %v3397_v42  ;;  %v3411_v16 = vld [vmem:[#allocation7 + $0xc0] ss:$28 sps:$4 sm:$0xff]  }
 0x2d3   :  { %2963 = vmatprep.subr.bf16.mxu0 %v3398_v43 }
 0x2d4   :  { %2942 = vmatpush3.bf16.msra.mxu1 %v3399_v44  ;;  %v994_v44 = vrot.slane %v3702_v6, %v297_v49 }
 0x2d5   :  { %2964 = vmatpush3.bf16.msra.mxu0 %v3400_v45  ;;  %2943 = vmatprep.subr.bf16.mxu1 %v3401_v46  ;;  %v998_v45 = vrot.slane %v3702_v6, %v301_v48 }
 0x2d6   :  { %2965 = vmatprep.subr.bf16.mxu0 %v3402_v47 }
 0x2d8   :  { %2944 = vmatpush3.bf16.msra.mxu1 %v3403_v50 }
 0x2d9   :  { %2966 = vmatpush3.bf16.msra.mxu0 %v3404_v51  ;;  %2945 = vmatprep.subr.bf16.mxu1 %v3405_v52 }
 0x2da   :  { %2967 = vmatprep.subr.bf16.mxu0 %v3406_v53 }
 0x2dc   :  { %2946 = vmatpush3.bf16.msra.mxu1 %v3407_v54 }
 0x2dd   :  { %2968 = vmatpush3.bf16.msra.mxu0 %v3408_v15  ;;  %2947 = vmatprep.subr.bf16.mxu1 %v3409_v55 }
 0x2de   :  { %2969 = vmatprep.subr.bf16.mxu0 %v3410_v56 }
 0x2e0   :  { %2948 = vmatpush3.bf16.msra.mxu1 %v3411_v16 }
 0x2e1   :  { %2970 = vmatpush3.bf16.msra.mxu0 %v3412_v57  ;;  %2949 = vmatprep.subr.bf16.mxu1 %v3413_v58 }
 0x2e2   :  { %2971 = vmatprep.subr.bf16.mxu0 %v3414_v59 }
 0x2e4   :  { %2950 = vmatpush3.bf16.msra.mxu1 %v3415_v60 }
 0x2e5   :  { %2972 = vmatpush3.bf16.msra.mxu0 %v3416_v61  ;;  %2951 = vmatprep.subr.bf16.mxu1 %v3417_v62 }
 0x2e6   :  { %2973 = vmatprep.subr.bf16.mxu0 %v3418_v63 }
 0x2e8   :  { %2952 = vmatpush3.bf16.msra.mxu1 %v3419_v0 }
 0x2e9   :  { %2974 = vmatpush3.bf16.msra.mxu0 %v3420_v1  ;;  %2953 = vmatprep.subr.bf16.mxu1 %v3421_v2 }
 0x2ea   :  { %2975 = vmatprep.subr.bf16.mxu0 %v3422_v3 }
 0x2ec   :  { %2954 = vmatpush3.bf16.msra.mxu1 %v3423_v4 }
 0x2ed   :  { %2976 = vmatpush3.bf16.msra.mxu0 %v3424_v5 }
 0x2ef   :  { %2461 = vmatmul.mubr.bf16.vlgmr.msra.gmra.mxu1 %v3679_v19 }
 0x2f0   :  { %2502 = vmatmul.mubr.bf16.vlgmr.msra.gmra.mxu0 %v3681_v20 }
 0x30f   :  { %v2204_v9 = vpop.f32.mrf.mxu1  ;;  %v2247_v10 = vpop.f32.mrf.mxu0 }
 0x310   :  { %v2205_v11 = vadd.f32 %v2204_v9, %v986_v7 }
 0x311   :  { %v2206_v12 = vpop.f32.mrf.mxu1  ;;  %v2249_v13 = vpop.f32.mrf.mxu0 }
 0x312   :  { %v2248_v14 = vadd.f32 %v2247_v10, %v2205_v11  ;;  %v2207_v19 = vadd.f32 %v2206_v12, %v990_v8 }
 0x313   :  { %v2208_v17 = vpop.f32.mrf.mxu1  ;;  %v2251_v20 = vpop.f32.mrf.mxu0 }
 0x314   :  { %v2925_v18 = vmul.f32 -1.442695, %v2248_v14  ;;  %v2250_v21 = vadd.f32 %v2249_v13, %v2207_v19  ;;  %v2209_v22 = vadd.f32 %v2208_v17, %v986_v7  ;;  %v1001_v13 = vsub.s32 4, %v3651_v25 }
 0x315   :  { %v2210_v23 = vpop.f32.mrf.mxu1  ;;  %v2253_v29 = vpop.f32.mrf.mxu0  ;;  %v1005_v14 = vsub.s32 5, %v3651_v25 }
 0x316   :  { %3425 = vpow2.f32 %v2925_v18  ;;  %v2926_v24 = vmul.f32 -1.442695, %v2250_v21  ;;  %v2252_v28 = vadd.f32 %v2251_v20, %v2209_v22  ;;  %v2211_v27 = vadd.f32 %v2210_v23, %v990_v8 }
 0x317   :  { %v1002_v19 = vrot.slane %v3702_v6, %v1001_v13  ;;  %v1006_v17 = vrot.slane %v3702_v6, %v1005_v14 }
 0x318   :  { %3427 = vpow2.f32 %v2926_v24  ;;  %v2932_v26 = vmul.f32 -1.442695, %v2252_v28  ;;  %v2254_v30 = vadd.f32 %v2253_v29, %v2211_v27 }
 0x31a   :  { %3429 = vpow2.f32 %v2932_v26  ;;  %v2933_v31 = vmul.f32 -1.442695, %v2254_v30 }
 0x31c   :  { %3431 = vpow2.f32 %v2933_v31 }
 0x323   :  { %v3426_v32 = vpop.eup %3425 }
 0x324   :  { %v2552_v33 = vadd.f32 1.0, %v3426_v32 }
 0x325   :  { %v3428_v34 = vpop.eup %3427 }
 0x326   :  { %3433 = vrcp.f32 %v2552_v33  ;;  %v2553_v35 = vadd.f32 1.0, %v3428_v34 }
 0x327   :  { %v3430_v36 = vpop.eup %3429 }
 0x328   :  { %3435 = vrcp.f32 %v2553_v35  ;;  %v2559_v37 = vadd.f32 1.0, %v3430_v36 }
 0x329   :  { %v3432_v38 = vpop.eup %3431 }
 0x32a   :  { %3437 = vrcp.f32 %v2559_v37  ;;  %v2560_v39 = vadd.f32 1.0, %v3432_v38 }
 0x32c   :  { %3439 = vrcp.f32 %v2560_v39 }
 0x333   :  { %v3434_v40 = vpop.eup %3433 }
 0x334   :  { %2594 = vst [vmem:[#allocation8] sm:$0xff] %v3434_v40 }
 0x335   :  { %v3436_v41 = vpop.eup %3435 }
 0x336   :  { %2595 = vst [vmem:[#allocation8 + $0x8] sm:$0xff] %v3436_v41 }
 0x337   :  { %v3438_v42 = vpop.eup %3437 }
 0x338   :  { %2601 = vst [vmem:[#allocation8 + $0x38] sm:$0xff] %v3438_v42 }
 0x339   :  { %v3440_v43 = vpop.eup %3439 }
 0x33a   :  { %2602 = vst [vmem:[#allocation8 + $0x40] sm:$0xff] %v3440_v43 }
 0x34f   :  { %v2290_v46 = vpop.f32.mrf.mxu1  ;;  %v2333_v47 = vpop.f32.mrf.mxu0 }
 0x350   :  { %v2291_v50 = vadd.f32 %v2290_v46, %v994_v44 }
 0x351   :  { %v2292_v51 = vpop.f32.mrf.mxu1  ;;  %v2335_v52 = vpop.f32.mrf.mxu0 }
 0x352   :  { %v2334_v53 = vadd.f32 %v2333_v47, %v2291_v50  ;;  %v2293_v54 = vadd.f32 %v2292_v51, %v998_v45  ;;  %v1009_v50 = vsub.s32 6, %v3651_v25 }
 0x353   :  { %v2294_v15 = vpop.f32.mrf.mxu1  ;;  %v2337_v55 = vpop.f32.mrf.mxu0 }
 0x354   :  { %v2927_v56 = vmul.f32 -1.442695, %v2334_v53  ;;  %v2336_v16 = vadd.f32 %v2335_v52, %v2293_v54  ;;  %v2295_v57 = vadd.f32 %v2294_v15, %v994_v44  ;;  %v1010_v53 = vrot.slane %v3702_v6, %v1009_v50 }
 0x355   :  { %v2296_v58 = vpop.f32.mrf.mxu1  ;;  %v2339_v61 = vpop.f32.mrf.mxu0 }
 0x356   :  { %3441 = vpow2.f32 %v2927_v56  ;;  %v2928_v59 = vmul.f32 -1.442695, %v2336_v16  ;;  %v2338_v49 = vadd.f32 %v2337_v55, %v2295_v57  ;;  %v2297_v60 = vadd.f32 %v2296_v58, %v998_v45 }
 0x358   :  { %3443 = vpow2.f32 %v2928_v59  ;;  %v2934_v48 = vmul.f32 -1.442695, %v2338_v49  ;;  %v2340_v62 = vadd.f32 %v2339_v61, %v2297_v60 }
 0x35a   :  { %3445 = vpow2.f32 %v2934_v48  ;;  %v2935_v63 = vmul.f32 -1.442695, %v2340_v62 }
 0x35c   :  { %3447 = vpow2.f32 %v2935_v63 }
 0x363   :  { %v3442_v0 = vpop.eup %3441 }
 0x364   :  { %v2554_v1 = vadd.f32 1.0, %v3442_v0 }
 0x365   :  { %v3444_v2 = vpop.eup %3443 }
 0x366   :  { %3449 = vrcp.f32 %v2554_v1  ;;  %v2555_v3 = vadd.f32 1.0, %v3444_v2 }
 0x367   :  { %v3446_v4 = vpop.eup %3445 }
 0x368   :  { %3451 = vrcp.f32 %v2555_v3  ;;  %v2561_v5 = vadd.f32 1.0, %v3446_v4 }
 0x369   :  { %v3448_v7 = vpop.eup %3447 }
 0x36a   :  { %3453 = vrcp.f32 %v2561_v5  ;;  %v2562_v8 = vadd.f32 1.0, %v3448_v7 }
 0x36c   :  { %3455 = vrcp.f32 %v2562_v8 }
 0x373   :  { %v3450_v9 = vpop.eup %3449 }
 0x374   :  { %2596 = vst [vmem:[#allocation8 + $0x10] sm:$0xff] %v3450_v9 }
 0x375   :  { %v3452_v10 = vpop.eup %3451 }
 0x376   :  { %2597 = vst [vmem:[#allocation8 + $0x18] sm:$0xff] %v3452_v10 }
 0x377   :  { %v3454_v11 = vpop.eup %3453 }
 0x378   :  { %2603 = vst [vmem:[#allocation8 + $0x48] sm:$0xff] %v3454_v11 }
 0x379   :  { %v3456_v12 = vpop.eup %3455 }
 0x37a   :  { %2604 = vst [vmem:[#allocation8 + $0x50] sm:$0xff] %v3456_v12 }
 0x38f   :  { %v2376_v20 = vpop.f32.mrf.mxu1 }
 0x390   :  { %v2377_v18 = vadd.f32 %v2376_v20, %v1002_v19  ;;  %v2419_v21 = vpop.f32.mrf.mxu0 }
 0x391   :  { %v2378_v22 = vpop.f32.mrf.mxu1 }
 0x392   :  { %v2420_v23 = vadd.f32 %v2419_v21, %v2377_v18  ;;  %v2379_v24 = vadd.f32 %v2378_v22, %v1006_v17  ;;  %v2421_v28 = vpop.f32.mrf.mxu0 }
 0x393   :  { %v2380_v27 = vpop.f32.mrf.mxu1 }
 0x394   :  { %v2929_v29 = vmul.f32 -1.442695, %v2420_v23  ;;  %v2422_v26 = vadd.f32 %v2421_v28, %v2379_v24  ;;  %v2381_v30 = vadd.f32 %v2380_v27, %v1002_v19  ;;  %v2423_v31 = vpop.f32.mrf.mxu0 }
 0x395   :  { %v2382_v32 = vpop.f32.mrf.mxu1 }
 0x396   :  { %3457 = vpow2.f32 %v2929_v29  ;;  %v2930_v33 = vmul.f32 -1.442695, %v2422_v26  ;;  %v2424_v34 = vadd.f32 %v2423_v31, %v2381_v30  ;;  %v2383_v35 = vadd.f32 %v2382_v32, %v1006_v17  ;;  %v2425_v36 = vpop.f32.mrf.mxu0 }
 0x398   :  { %3459 = vpow2.f32 %v2930_v33  ;;  %v2936_v37 = vmul.f32 -1.442695, %v2424_v34  ;;  %v2426_v38 = vadd.f32 %v2425_v36, %v2383_v35 }
 0x39a   :  { %3461 = vpow2.f32 %v2936_v37  ;;  %v2937_v39 = vmul.f32 -1.442695, %v2426_v38 }
 0x39c   :  { %3463 = vpow2.f32 %v2937_v39 }
 0x3a3   :  { %v3458_v40 = vpop.eup %3457 }
 0x3a4   :  { %v2556_v41 = vadd.f32 1.0, %v3458_v40 }
 0x3a5   :  { %v3460_v42 = vpop.eup %3459 }
 0x3a6   :  { %3465 = vrcp.f32 %v2556_v41  ;;  %v2557_v43 = vadd.f32 1.0, %v3460_v42 }
 0x3a7   :  { %v3462_v44 = vpop.eup %3461 }
 0x3a8   :  { %3467 = vrcp.f32 %v2557_v43  ;;  %v2563_v45 = vadd.f32 1.0, %v3462_v44 }
 0x3a9   :  { %v3464_v46 = vpop.eup %3463 }
 0x3aa   :  { %3469 = vrcp.f32 %v2563_v45  ;;  %v2564_v47 = vadd.f32 1.0, %v3464_v46 }
 0x3ac   :  { %3471 = vrcp.f32 %v2564_v47 }
 0x3af   :  { %v2955_v51 = vpop.f32.mrf.mxu1 }
 0x3b0   :  { %v2977_v52 = vpop.f32.mrf.mxu0 }
 0x3b1   :  { %v2956_v54 = vpop.f32.mrf.mxu1 }
 0x3b2   :  { %v2957_v15 = vadd.f32 %v2956_v54, %v2955_v51  ;;  %v2978_v55 = vpop.f32.mrf.mxu0 }
 0x3b3   :  { %v3466_v56 = vpop.eup %3465  ;;  %v2958_v16 = vpop.f32.mrf.mxu1  ;;  %v2979_v58 = vadd.f32 %v2978_v55, %v2977_v52 }
 0x3b4   :  { %2598 = vst [vmem:[#allocation8 + $0x20] sm:$0xff] %v3466_v56  ;;  %v2463_v57 = vadd.f32 %v2957_v15, %v1010_v53  ;;  %v2980_v59 = vpop.f32.mrf.mxu0 }
 0x3b5   :  { %v3468_v49 = vpop.eup %3467  ;;  %v2959_v60 = vpop.f32.mrf.mxu1 }
 0x3b6   :  { %2599 = vst [vmem:[#allocation8 + $0x28] sm:$0xff] %v3468_v49  ;;  %v2504_v61 = vadd.f32 %v2979_v58, %v2463_v57  ;;  %v2960_v48 = vadd.f32 %v2959_v60, %v2958_v16  ;;  %v2981_v62 = vpop.f32.mrf.mxu0 }
 0x3b7   :  { %v3470_v25 = vpop.eup %3469  ;;  %v2982_v6 = vadd.f32 %v2981_v62, %v2980_v59 }
 0x3b8   :  { %2605 = vst [vmem:[#allocation8 + $0x58] sm:$0xff] %v3470_v25  ;;  %v2931_v63 = vmul.f32 -1.442695, %v2504_v61  ;;  %v2466_v0 = vadd.f32 %v2960_v48, %v1010_v53 }
 0x3b9   :  { %v3472_v1 = vpop.eup %3471 }
 0x3ba   :  { %2606 = vst [vmem:[#allocation8 + $0x60] sm:$0xff] %v3472_v1  ;;  %3473 = vpow2.f32 %v2931_v63  ;;  %v2507_v2 = vadd.f32 %v2982_v6, %v2466_v0 }
 0x3bc   :  { %v2938_v3 = vmul.f32 -1.442695, %v2507_v2 }
 0x3be   :  { %3475 = vpow2.f32 %v2938_v3 }
 0x3c7   :  { %v3474_v4 = vpop.eup %3473 }
 0x3c8   :  { %v2558_v5 = vadd.f32 1.0, %v3474_v4 }
 0x3ca   :  { %3477 = vrcp.f32 %v2558_v5 }
 0x3cb   :  { %v3476_v7 = vpop.eup %3475 }
 0x3cc   :  { %v2565_v8 = vadd.f32 1.0, %v3476_v7 }
 0x3ce   :  { %3479 = vrcp.f32 %v2565_v8 }
 0x3d7   :  { %v3478_v9 = vpop.eup %3477 }
 0x3d8   :  { %2600 = vst [vmem:[#allocation8 + $0x30] sm:$0xff] %v3478_v9 }
 0x3db   :  { %v3480_v10 = vpop.eup %3479 }
 0x3dc   :  { %2607 = vst [vmem:[#allocation8 + $0x68] sm:$0xff] %v3480_v10 }
 0x3dd   :  { %3552 = shalt.err (!%p3549_p5)
}
 0x3de   :  { %s3578_s17 = smov 896   ;;  %s3579_s18 = smov 56  }
 0x3df   :  { %2619 = dma.vmem_to_hbm [thread:$0]  %s2614_s15, 1792, %s3732_s9, [#allocation4], %s3578_s17, %s3578_s17, %s3579_s18  }
 0x3e0   :  { %3565 = dma.done.wait [#allocation4], 1792  }
 0x3e1   :  { %3566 = vsyncadd [#allocation4], 4294965504 }
 0x3e2   :  { %2623 = vsyncpa [#allocation3], 1 }
 0x3e3   :  { %2624 = vsyncpa [#allocation6], 1 }
 0x3e4   :  { %2625 = vsyncpa [#allocation4], 1 }

</bundles_post_ra>
